<compile_context>
chip_gen: v6e
topology: v6e:2x2x1
jax: 0.10.0
libtpu: 0.0.40
codegen_flags: <defaults>
</compile_context>

<pallas_src>
import jax
import jax.numpy as jnp
from jax.experimental import pallas as pl
from jax.experimental.pallas import tpu as pltpu

K_IN = 28 * 28   # 784  (multiple of 8 sublanes; full-extent last dim of x)
HID = 512
OUT = 10
OUT_PAD = 128    # lane-dense output slab (wrapper slices back to 10)


def mlp_kernel(x_ref, w1_ref, b1_ref, w2_ref, b2_ref, w3_ref, b3_ref, o_ref):
    # x_ref:  (TM, 784) f32          w1_ref: (784, 512) bf16   b1_ref: (1, 512) f32
    # w2_ref: (512, 512) bf16        b2_ref: (1, 512) f32
    # w3_ref: (512, 128) bf16        b3_ref: (1, 128) f32      o_ref:  (TM, 128) f32
    x = x_ref[...].astype(jnp.bfloat16)  # in-kernel cast (saves a wrapper HBM pass)

    h1 = jnp.dot(x, w1_ref[...], preferred_element_type=jnp.float32) + b1_ref[...]
    h1 = jnp.maximum(h1, 0.0).astype(jnp.bfloat16)

    h2 = jnp.dot(h1, w2_ref[...], preferred_element_type=jnp.float32) + b2_ref[...]
    h2 = jnp.maximum(h2, 0.0).astype(jnp.bfloat16)

    logits = jnp.dot(h2, w3_ref[...], preferred_element_type=jnp.float32) + b3_ref[...]
    o_ref[...] = logits.astype(o_ref.dtype)


def _pick_tile(B):
    # Large batches: big tiles to amortize per-step pipeline overhead.
    # Mid batches: guarantee >= 2 grid steps so both v7x TensorCores are used.
    # Small batches: multiple of 16 (bf16 sublane packing).
    if B >= 4096:
        return 1024
    if B >= 1024:
        return 512
    if B >= 512:
        return 256
    if B >= 256:
        return 128
    return max(16, ((B + 15) // 16) * 16)


def neural_network_forward(x_nchw, params):
    """x_nchw: (B, 1, 28, 28) float32. Returns (B, 10) float32 logits."""
    B = x_nchw.shape[0]

    # nn.Flatten(): row-major flatten of everything after batch dim. Stays f32.
    x = x_nchw.reshape(B, -1)  # (B, 784) f32

    TM = _pick_tile(B)
    B_pad = pl.cdiv(B, TM) * TM
    if B_pad != B:
        x = jnp.pad(x, ((0, B_pad - B), (0, 0)))  # only when B is not a tile multiple

    w1, b1 = params["w1"], params["b1"]  # (784, 512) bf16, (1, 512) f32
    w2, b2 = params["w2"], params["b2"]  # (512, 512) bf16, (1, 512) f32
    w3, b3 = params["w3"], params["b3"]  # (512, 128) bf16, (1, 128) f32

    # Constant index_map -> fetched once, VMEM-resident across the whole grid.
    # Buffered(1): never re-fetched, so skip the default second buffer.
    def resident(shape):
        return pl.BlockSpec(shape, lambda i: (0, 0), pipeline_mode=pl.Buffered(1))

    # TODO(synk): for latency-critical tiny batches (B <= ~64) the kernel is
    # weight-DMA bound; hide that DMA with a cross-pallas_call weight prefetch
    # (SEMAPHORE + VMEM outputs produced by a prior call) in a serving setup.
    out = pl.pallas_call(
        mlp_kernel,
        out_shape=jax.ShapeDtypeStruct((B_pad, OUT_PAD), jnp.float32),
        grid=(B_pad // TM,),
        in_specs=[
            pl.BlockSpec((TM, K_IN), lambda i: (i, 0)),   # x: tiled over batch
            resident(w1.shape), resident(b1.shape),
            resident(w2.shape), resident(b2.shape),
            resident(w3.shape), resident(b3.shape),
        ],
        out_specs=pl.BlockSpec((TM, OUT_PAD), lambda i: (i, 0)),
        compiler_params=pltpu.CompilerParams(
            dimension_semantics=("parallel",),
            vmem_limit_bytes=40 << 20,   # fits TM=1024 buffers; < v7x 64 MiB physical
        ),
    )(x, w1, b1, w2, b2, w3, b3)

    # Drop batch padding and the lane padding of the last layer.
    return out[:B, :OUT]


def init_params(key):
    """Deterministic init mirroring nn.Linear default (uniform +-1/sqrt(fan_in)).
    Weights pre-transposed to (in, out); only the output layer is lane-padded to 128.
    Weights bf16, biases f32."""
    dims = [(K_IN, HID), (HID, HID), (HID, OUT)]
    pads = [(K_IN, HID), (HID, HID), (HID, OUT_PAD)]
    params = {}
    keys = jax.random.split(key, 2 * len(dims))
    for i, ((fan_in, fan_out), (pin, pout)) in enumerate(zip(dims, pads)):
        bound = 1.0 / jnp.sqrt(jnp.float32(fan_in))
        w = jax.random.uniform(keys[2 * i], (fan_in, fan_out),
                               dtype=jnp.float32, minval=-bound, maxval=bound)
        b = jax.random.uniform(keys[2 * i + 1], (1, fan_out),
                               dtype=jnp.float32, minval=-bound, maxval=bound)
        w = jnp.pad(w, ((0, pin - fan_in), (0, pout - fan_out))).astype(jnp.bfloat16)
        b = jnp.pad(b, ((0, 0), (0, pout - fan_out)))  # f32
        params[f"w{i + 1}"] = w
        params[f"b{i + 1}"] = b
    return params


if __name__ == "__main__":
    key = jax.random.PRNGKey(0)
    k_x, k_p = jax.random.split(key)

    # Small MNIST-style batch: (B, C, H, W) = (2, 1, 28, 28), NCHW like PyTorch.
    x = jax.random.normal(k_x, (2, 1, 28, 28), dtype=jnp.float32)
    params = init_params(k_p)

    logits = neural_network_forward(x, params)
    logits = jax.block_until_ready(logits)

    assert logits.shape == (2, 10)
    assert logits.dtype == jnp.float32

    # Reference check in plain JAX with the same bf16-matmul / f32-accumulate math.
    xf = x.reshape(2, -1).astype(jnp.bfloat16)
    h = jnp.maximum(
        jnp.dot(xf, params["w1"], preferred_element_type=jnp.float32) + params["b1"], 0.0
    ).astype(jnp.bfloat16)
    h = jnp.maximum(
        jnp.dot(h, params["w2"], preferred_element_type=jnp.float32) + params["b2"], 0.0
    ).astype(jnp.bfloat16)
    ref = (jnp.dot(h, params["w3"][:, :OUT], preferred_element_type=jnp.float32)
           + params["b3"][:, :OUT])
    assert jnp.allclose(logits, ref, atol=2e-2, rtol=2e-2)

    print("KERNEL_OK")
</pallas_src>

<mosaic_0001>
module attributes {stable_mosaic.version = 11 : i64} {
  func.func @mlp_kernel(%arg0: i32, %arg1: memref<16x784xf32, #tpu.memory_space<vmem>>, %arg2: memref<784x512xbf16, #tpu.memory_space<vmem>>, %arg3: memref<1x512xf32, #tpu.memory_space<vmem>>, %arg4: memref<512x512xbf16, #tpu.memory_space<vmem>>, %arg5: memref<1x512xf32, #tpu.memory_space<vmem>>, %arg6: memref<512x128xbf16, #tpu.memory_space<vmem>>, %arg7: memref<1x128xf32, #tpu.memory_space<vmem>>, %arg8: memref<16x128xf32, #tpu.memory_space<vmem>>) attributes {dimension_semantics = [#tpu.dimension_semantics<parallel>], iteration_bounds = array<i64: 1>, scalar_prefetch = 0 : i64, scratch_operands = 0 : i64, tpu.core_type = #tpu.core_type<tc>, window_params = [{transform_indices = @transform_0, window_bounds = array<i64: 16, 784>}, {pipeline_mode = #tpu.pipeline_mode<synchronous>, transform_indices = @transform_1, window_bounds = array<i64: 784, 512>}, {pipeline_mode = #tpu.pipeline_mode<synchronous>, transform_indices = @transform_2, window_bounds = array<i64: 1, 512>}, {pipeline_mode = #tpu.pipeline_mode<synchronous>, transform_indices = @transform_3, window_bounds = array<i64: 512, 512>}, {pipeline_mode = #tpu.pipeline_mode<synchronous>, transform_indices = @transform_4, window_bounds = array<i64: 1, 512>}, {pipeline_mode = #tpu.pipeline_mode<synchronous>, transform_indices = @transform_5, window_bounds = array<i64: 512, 128>}, {pipeline_mode = #tpu.pipeline_mode<synchronous>, transform_indices = @transform_6, window_bounds = array<i64: 1, 128>}, {transform_indices = @transform_7, window_bounds = array<i64: 16, 128>}]} {
    %c0 = arith.constant 0 : index
    %c0_0 = arith.constant 0 : index
    %0 = vector.load %arg1[%c0, %c0_0] : memref<16x784xf32, #tpu.memory_space<vmem>>, vector<16x784xf32>
    %1 = arith.truncf %0 : vector<16x784xf32> to vector<16x784xbf16>
    %c0_1 = arith.constant 0 : index
    %c0_2 = arith.constant 0 : index
    %2 = vector.load %arg2[%c0_1, %c0_2] : memref<784x512xbf16, #tpu.memory_space<vmem>>, vector<784x512xbf16>
    %cst = arith.constant dense<0.000000e+00> : vector<16x512xf32>
    %3 = tpu.matmul %1, %2, %cst {dimension_numbers = #tpu.dot_dimension_numbers<[1], [0], [0], [1], [0, 0, 1, 1], [], []>} : vector<16x784xbf16>, vector<784x512xbf16>, vector<16x512xf32> -> vector<16x512xf32>
    %c0_3 = arith.constant 0 : index
    %c0_4 = arith.constant 0 : index
    %4 = vector.load %arg3[%c0_3, %c0_4] : memref<1x512xf32, #tpu.memory_space<vmem>>, vector<1x512xf32>
    %5 = vector.broadcast %4 : vector<1x512xf32> to vector<16x512xf32>
    %6 = arith.addf %3, %5 : vector<16x512xf32>
    %cst_5 = arith.constant 0.000000e+00 : f32
    %7 = vector.broadcast %cst_5 : f32 to vector<16x512xf32>
    %8 = arith.maximumf %6, %7 : vector<16x512xf32>
    %9 = arith.truncf %8 : vector<16x512xf32> to vector<16x512xbf16>
    %c0_6 = arith.constant 0 : index
    %c0_7 = arith.constant 0 : index
    %10 = vector.load %arg4[%c0_6, %c0_7] : memref<512x512xbf16, #tpu.memory_space<vmem>>, vector<512x512xbf16>
    %cst_8 = arith.constant dense<0.000000e+00> : vector<16x512xf32>
    %11 = tpu.matmul %9, %10, %cst_8 {dimension_numbers = #tpu.dot_dimension_numbers<[1], [0], [0], [1], [0, 0, 1, 1], [], []>} : vector<16x512xbf16>, vector<512x512xbf16>, vector<16x512xf32> -> vector<16x512xf32>
    %c0_9 = arith.constant 0 : index
    %c0_10 = arith.constant 0 : index
    %12 = vector.load %arg5[%c0_9, %c0_10] : memref<1x512xf32, #tpu.memory_space<vmem>>, vector<1x512xf32>
    %13 = vector.broadcast %12 : vector<1x512xf32> to vector<16x512xf32>
    %14 = arith.addf %11, %13 : vector<16x512xf32>
    %cst_11 = arith.constant 0.000000e+00 : f32
    %15 = vector.broadcast %cst_11 : f32 to vector<16x512xf32>
    %16 = arith.maximumf %14, %15 : vector<16x512xf32>
    %17 = arith.truncf %16 : vector<16x512xf32> to vector<16x512xbf16>
    %c0_12 = arith.constant 0 : index
    %c0_13 = arith.constant 0 : index
    %18 = vector.load %arg6[%c0_12, %c0_13] : memref<512x128xbf16, #tpu.memory_space<vmem>>, vector<512x128xbf16>
    %cst_14 = arith.constant dense<0.000000e+00> : vector<16x128xf32>
    %19 = tpu.matmul %17, %18, %cst_14 {dimension_numbers = #tpu.dot_dimension_numbers<[1], [0], [0], [1], [0, 0, 1, 1], [], []>} : vector<16x512xbf16>, vector<512x128xbf16>, vector<16x128xf32> -> vector<16x128xf32>
    %c0_15 = arith.constant 0 : index
    %c0_16 = arith.constant 0 : index
    %20 = vector.load %arg7[%c0_15, %c0_16] : memref<1x128xf32, #tpu.memory_space<vmem>>, vector<1x128xf32>
    %21 = vector.broadcast %20 : vector<1x128xf32> to vector<16x128xf32>
    %22 = arith.addf %19, %21 : vector<16x128xf32>
    %c0_17 = arith.constant 0 : index
    %c0_18 = arith.constant 0 : index
    %23 = vector.load %arg8[%c0_17, %c0_18] : memref<16x128xf32, #tpu.memory_space<vmem>>, vector<16x128xf32>
    tpu.vector_store %arg8[%c0_17, %c0_18], %22 {strides = array<i32>} : memref<16x128xf32, #tpu.memory_space<vmem>>, vector<16x128xf32>,
    return
  }
  func.func @transform_0(%arg0: i32) -> (i32, i32) {
    %c0_i32 = arith.constant 0 : i32
    %c0_i32_0 = arith.constant 0 : i32
    return %arg0, %c0_i32 : i32, i32
  }
  func.func @transform_1(%arg0: i32) -> (i32, i32) {
    %c0_i32 = arith.constant 0 : i32
    %c0_i32_0 = arith.constant 0 : i32
    %c0_i32_1 = arith.constant 0 : i32
    return %c0_i32, %c0_i32_0 : i32, i32
  }
  func.func @transform_2(%arg0: i32) -> (i32, i32) {
    %c0_i32 = arith.constant 0 : i32
    %c0_i32_0 = arith.constant 0 : i32
    %c0_i32_1 = arith.constant 0 : i32
    return %c0_i32, %c0_i32_0 : i32, i32
  }
  func.func @transform_3(%arg0: i32) -> (i32, i32) {
    %c0_i32 = arith.constant 0 : i32
    %c0_i32_0 = arith.constant 0 : i32
    %c0_i32_1 = arith.constant 0 : i32
    return %c0_i32, %c0_i32_0 : i32, i32
  }
  func.func @transform_4(%arg0: i32) -> (i32, i32) {
    %c0_i32 = arith.constant 0 : i32
    %c0_i32_0 = arith.constant 0 : i32
    %c0_i32_1 = arith.constant 0 : i32
    return %c0_i32, %c0_i32_0 : i32, i32
  }
  func.func @transform_5(%arg0: i32) -> (i32, i32) {
    %c0_i32 = arith.constant 0 : i32
    %c0_i32_0 = arith.constant 0 : i32
    %c0_i32_1 = arith.constant 0 : i32
    return %c0_i32, %c0_i32_0 : i32, i32
  }
  func.func @transform_6(%arg0: i32) -> (i32, i32) {
    %c0_i32 = arith.constant 0 : i32
    %c0_i32_0 = arith.constant 0 : i32
    %c0_i32_1 = arith.constant 0 : i32
    return %c0_i32, %c0_i32_0 : i32, i32
  }
  func.func @transform_7(%arg0: i32) -> (i32, i32) {
    %c0_i32 = arith.constant 0 : i32
    %c0_i32_0 = arith.constant 0 : i32
    return %arg0, %c0_i32 : i32, i32
  }
}

</mosaic_0001>

<bundles_post_ra>
// kernel: tpu_custom_call.1
= control target key start
LH: loop header
LB: loop body
LE: loop exit
PB: predicated region body
PF: predicated region fallthrough
CT: control target
= control target key end

     0   :  { %12 = vsyncpa [#allocation3], 0  ;;  %s4224_s0 = inlined_call_operand.hbm [shape: f32[16,784], index: 0, kind: input, shape index: {}]   ;;  %s4225_s1 = inlined_call_operand.hbm [shape: bf16[784,512], index: 1, kind: input, shape index: {}]   ;;  %s4226_s2 = inlined_call_operand.hbm [shape: f32[1,512], index: 2, kind: input, shape index: {}]   ;;  %s4227_s3 = inlined_call_operand.hbm [shape: bf16[512,512], index: 3, kind: input, shape index: {}]   ;;  %s4228_s4 = inlined_call_operand.vmem [shape: f32[1,512], index: 4, kind: input, shape index: {}]   ;;  %s4229_s5 = inlined_call_operand.hbm [shape: bf16[512,128], index: 5, kind: input, shape index: {}]   ;;  %s4230_s6 = inlined_call_operand.vmem [shape: f32[1,128], index: 6, kind: input, shape index: {}]   ;;  %s4231_s7 = inlined_call_operand.hbm [shape: f32[16,128], index: 7, kind: output, shape index: {}]  }
   0x1   :  { %13 = vsyncpa [#allocation6], 0 }
   0x2   :  { %14 = vsyncpa [#allocation9], 0 }
   0x3   :  { %15 = vsyncpa [#allocation4], 0  ;;  %s4077_s24 = smov [#allocation5]  }
   0x4   :  { %s33_s25 = sshll.u32 %s4077_s24, 4  ;;  %s34_s25 = int_to_ptr.vmem [resolvable:$true] %s33_s25 }
   0x5   :  { %s3957_s26 = scalar_lea.vmem %s34_s25, 25088  ;;  %p3962_p1 = scmp.lt.s32.totalorder %s34_s25, %s34_s25 }
   0x6   :  { %p3958_p0 = scmp.ne.s32.totalorder %s34_s25, %s3957_s26  ;;  %p3963_p2 = scmp.lt.s32.totalorder %s3957_s26, %s3957_s26 }
   0x8   :  { %p3964_p3 = por %p3963_p2, %p3962_p1 }
   0xa   :  { %p3965_p4 = pnand %p3964_p3, %p3958_p0 }
   0xc   :  { %3968 = shalt.err (!%p3965_p4)
}
   0xd   :  { %s4078_s27 = smov 256   ;;  %s4079_s28 = smov 16  }
   0xe   :  { %39 = dma.hbm_to_vmem [thread:$0]  %s4225_s1, 25088, %s34_s25, [#allocation6], %s4078_s27, %s4078_s27, %s4079_s28  }
   0xf   :  { %s4080_s8 = smov [#allocation8]   ;;  %s4081_s10 = smov [#allocation2]  }
  0x10   :  { %s55_s9 = sshll.u32 %s4080_s8, 4  ;;  %s21_s11 = sshll.u32 %s4081_s10, 4  ;;  %s56_s9 = int_to_ptr.vmem [resolvable:$true] %s55_s9  ;;  %s22_s11 = int_to_ptr.vmem [resolvable:$true] %s21_s11 }
  0x11   :  { %s3977_s12 = scalar_lea.vmem %s56_s9, 16384  ;;  %p3982_p6 = scmp.lt.s32.totalorder %s56_s9, %s56_s9 }
  0x12   :  { %p3978_p5 = scmp.ne.s32.totalorder %s56_s9, %s3977_s12  ;;  %p3983_p7 = scmp.lt.s32.totalorder %s3977_s12, %s3977_s12 }
  0x14   :  { %p3984_p8 = por %p3983_p7, %p3982_p6 }
  0x16   :  { %p3985_p9 = pnand %p3984_p8, %p3978_p5 }
  0x18   :  { %3988 = shalt.err (!%p3985_p9)
}
  0x19   :  { %61 = dma.hbm_to_vmem [thread:$0]  %s4227_s3, 16384, %s56_s9, [#allocation9], %s4078_s27, %s4078_s27, %s4079_s28  }
  0x1a   :  { %s3997_s15 = scalar_lea.vmem %s22_s11, 1792  ;;  %p4002_p11 = scmp.lt.s32.totalorder %s22_s11, %s22_s11 }
  0x1b   :  { %p3998_p10 = scmp.ne.s32.totalorder %s22_s11, %s3997_s15  ;;  %p4003_p12 = scmp.lt.s32.totalorder %s3997_s15, %s3997_s15 }
  0x1d   :  { %p4004_p13 = por %p4003_p12, %p4002_p11 }
  0x1f   :  { %p4005_p0 = pnand %p4004_p13, %p3998_p10 }
  0x21   :  { %4008 = shalt.err (!%p4005_p0)
}
  0x22   :  { %s4082_s1 = smov 896   ;;  %s4083_s16 = smov 56  }
  0x23   :  { %27 = dma.hbm_to_vmem [thread:$0]  %s4224_s0, 1792, %s22_s11, [#allocation3], %s4082_s1, %s4082_s1, %s4083_s16  }
  0x24   :  { %s4084_s19 = smov [#allocation7]   ;;  %s4085_s21 = smov [#allocation10]  }
  0x25   :  { %s46_s20 = sshll.u32 %s4084_s19, 4  ;;  %s69_s22 = sshll.u32 %s4085_s21, 4  ;;  %s47_s20 = int_to_ptr.vmem [resolvable:$true] %s46_s20  ;;  %s70_s22 = int_to_ptr.vmem [resolvable:$true] %s69_s22 }
  0x26   :  { %s4017_s3 = scalar_lea.vmem %s47_s20, 64  ;;  %p4022_p2 = scmp.lt.s32.totalorder %s47_s20, %s47_s20 }
  0x27   :  { %p4018_p1 = scmp.ne.s32.totalorder %s47_s20, %s4017_s3  ;;  %p4023_p3 = scmp.lt.s32.totalorder %s4017_s3, %s4017_s3 }
  0x29   :  { %p4024_p4 = por %p4023_p3, %p4022_p2 }
  0x2b   :  { %p4025_p5 = pnand %p4024_p4, %p4018_p1 }
  0x2d   :  { %4028 = shalt.err (!%p4025_p5)
}
  0x2e   :  { %49 = dma.hbm_to_vmem [thread:$0]  %s4226_s2, 64, %s47_s20, [#allocation6]  }
  0x2f   :  { %s4037_s25 = scalar_lea.vmem %s70_s22, 4096  ;;  %p4042_p7 = scmp.lt.s32.totalorder %s70_s22, %s70_s22 }
  0x30   :  { %p4038_p6 = scmp.ne.s32.totalorder %s70_s22, %s4037_s25  ;;  %p4043_p8 = scmp.lt.s32.totalorder %s4037_s25, %s4037_s25 }
  0x32   :  { %p4044_p9 = por %p4043_p8, %p4042_p7 }
  0x34   :  { %p4045_p10 = pnand %p4044_p9, %p4038_p6 }
  0x36   :  { %4048 = shalt.err (!%p4045_p10)
}
  0x37   :  { %s4086_s0 = smov 64   ;;  %s4087_s26 = smov 4  }
  0x38   :  { %75 = dma.hbm_to_vmem [thread:$0]  %s4229_s5, 4096, %s70_s22, [#allocation9], %s4086_s0, %s4086_s0, %s4087_s26  }
  0x39   :  { %4069 = dma.done.wait [#allocation3], 1792  }
  0x3a   :  { %4070 = vsyncadd [#allocation3], 4294965504 }
  0x3b   :  { %4071 = dma.done.wait [#allocation6], 25152  }
  0x3c   :  { %4072 = vsyncadd [#allocation6], 4294942144 }
  0x3d   :  { %4073 = dma.done.wait [#allocation9], 20480  }
  0x3e   :  { %4074 = vsyncadd [#allocation9], 4294946816  ;;  %v3431_v0 = vld [vmem:[#allocation5 + $0xe4] ss:$16 sps:$4 sm:$0xff]   ;;  %v3435_v2 = vld [vmem:[#allocation5 + $0xe0] ss:$16 sps:$4 sm:$0xff]  }
  0x3f   :  { %v3433_v1 = vld [vmem:[#allocation5 + $0x2e4] ss:$16 sps:$4 sm:$0xff]   ;;  %1317 = vmatprep.subr.bf16.mxu0 %v3431_v0  ;;  %v3436_v3 = vld [vmem:[#allocation5 + $0x2e0] ss:$16 sps:$4 sm:$0xff]   ;;  %v95_v46 = vld [vmem:[#allocation2 + $0x8] sm:$0xff]  ;;  %vm1313_vm0 = vcmask 130048  }
  0x40   :  { %1360 = vmatprep.subr.bf16.mxu1 %v3433_v1  ;;  %v3437_v4 = vld [vmem:[#allocation5 + $0xc4] ss:$16 sps:$4 sm:$0xff]   ;;  %1318 = vmatpush1.bf16.msra.mxu0 %v3435_v2  ;;  %v3441_v6 = vld [vmem:[#allocation5 + $0xc0] ss:$16 sps:$4 sm:$0xff]   ;;  %v97_v48 = vld [vmem:[#allocation2 + $0x18] sm:$0xff]  ;;  %s4089_s30 = smov [#allocation11]  }
  0x41   :  { %1361 = vmatpush1.bf16.msra.mxu1 %v3436_v3  ;;  %v3439_v5 = vld [vmem:[#allocation5 + $0x2c4] ss:$16 sps:$4 sm:$0xff]   ;;  %1319 = vmatprep.subr.bf16.mxu0 %v3437_v4  ;;  %v3442_v7 = vld [vmem:[#allocation5 + $0x2c0] ss:$16 sps:$4 sm:$0xff]   ;;  %s2999_s8 = sshll.u32 %s4089_s30, 4  ;;  %s3000_s8 = int_to_ptr.vmem [resolvable:$true] %s2999_s8 }
  0x42   :  { %1362 = vmatprep.subr.bf16.mxu1 %v3439_v5  ;;  %v3443_v8 = vld [vmem:[#allocation5 + $0xa4] ss:$16 sps:$4 sm:$0xff]   ;;  %v3447_v10 = vld [vmem:[#allocation5 + $0xa0] ss:$16 sps:$4 sm:$0xff]   ;;  %s4049_s9 = scalar_lea.vmem %s3000_s8, 256  ;;  %p4054_p12 = scmp.lt.s32.totalorder %s3000_s8, %s3000_s8 }
  0x43   :  { %v3445_v9 = vld [vmem:[#allocation5 + $0x2a4] ss:$16 sps:$4 sm:$0xff]   ;;  %v3448_v11 = vld [vmem:[#allocation5 + $0x2a0] ss:$16 sps:$4 sm:$0xff]   ;;  %p4050_p11 = scmp.ne.s32.totalorder %s3000_s8, %s4049_s9  ;;  %p4055_p13 = scmp.lt.s32.totalorder %s4049_s9, %s4049_s9 }
  0x44   :  { %1320 = vmatpush1.bf16.msra.mxu0 %v3441_v6  ;;  %v3449_v12 = vld [vmem:[#allocation5 + $0x84] ss:$16 sps:$4 sm:$0xff]   ;;  %v3453_v14 = vld [vmem:[#allocation5 + $0x80] ss:$16 sps:$4 sm:$0xff]  }
  0x45   :  { %1363 = vmatpush1.bf16.msra.mxu1 %v3442_v7  ;;  %1321 = vmatprep.subr.bf16.mxu0 %v3443_v8  ;;  %v3451_v13 = vld [vmem:[#allocation5 + $0x284] ss:$16 sps:$4 sm:$0xff]   ;;  %v3454_v15 = vld [vmem:[#allocation5 + $0x280] ss:$16 sps:$4 sm:$0xff]   ;;  %v101_v7 = vld [vmem:[#allocation2 + $0x38] sm:$0xff]  ;;  %p4056_p0 = por %p4055_p13, %p4054_p12 }
  0x46   :  { %1364 = vmatprep.subr.bf16.mxu1 %v3445_v9  ;;  %v3455_v16 = vld [vmem:[#allocation5 + $0x64] ss:$16 sps:$4 sm:$0xff]   ;;  %v3459_v18 = vld [vmem:[#allocation5 + $0x60] ss:$16 sps:$4 sm:$0xff]   ;;  %v103_v9 = vld [vmem:[#allocation2 + $0x48] sm:$0xff] }
  0x47   :  { %v3457_v17 = vld [vmem:[#allocation5 + $0x264] ss:$16 sps:$4 sm:$0xff]   ;;  %v3460_v19 = vld [vmem:[#allocation5 + $0x260] ss:$16 sps:$4 sm:$0xff]   ;;  %p4057_p1 = pnand %p4056_p0, %p4050_p11 }
  0x48   :  { %1322 = vmatpush1.bf16.msra.mxu0 %v3447_v10  ;;  %v3461_v20 = vld [vmem:[#allocation5 + $0x44] ss:$16 sps:$4 sm:$0xff]   ;;  %v3465_v22 = vld [vmem:[#allocation5 + $0x40] ss:$16 sps:$4 sm:$0xff]  }
  0x49   :  { %1365 = vmatpush1.bf16.msra.mxu1 %v3448_v11  ;;  %1323 = vmatprep.subr.bf16.mxu0 %v3449_v12  ;;  %v3463_v21 = vld [vmem:[#allocation5 + $0x244] ss:$16 sps:$4 sm:$0xff]   ;;  %v3466_v23 = vld [vmem:[#allocation5 + $0x240] ss:$16 sps:$4 sm:$0xff]  }
  0x4a   :  { %1366 = vmatprep.subr.bf16.mxu1 %v3451_v13  ;;  %v3467_v24 = vld [vmem:[#allocation5 + $0x24] ss:$16 sps:$4 sm:$0xff]   ;;  %v3471_v26 = vld [vmem:[#allocation5 + $0x20] ss:$16 sps:$4 sm:$0xff]  }
  0x4b   :  { %v3469_v25 = vld [vmem:[#allocation5 + $0x224] ss:$16 sps:$4 sm:$0xff]   ;;  %v3472_v27 = vld [vmem:[#allocation5 + $0x220] ss:$16 sps:$4 sm:$0xff]  }
  0x4c   :  { %1324 = vmatpush1.bf16.msra.mxu0 %v3453_v14  ;;  %v3473_v28 = vld [vmem:[#allocation5 + $0x4] ss:$16 sps:$4 sm:$0xff]   ;;  %v3477_v30 = vld [vmem:[#allocation5] ss:$16 sps:$4 sm:$0xff]  }
  0x4d   :  { %1367 = vmatpush1.bf16.msra.mxu1 %v3454_v15  ;;  %1325 = vmatprep.subr.bf16.mxu0 %v3455_v16  ;;  %v3475_v29 = vld [vmem:[#allocation5 + $0x204] ss:$16 sps:$4 sm:$0xff]   ;;  %v3478_v31 = vld [vmem:[#allocation5 + $0x200] ss:$16 sps:$4 sm:$0xff]  }
  0x4e   :  { %1368 = vmatprep.subr.bf16.mxu1 %v3457_v17  ;;  %v3479_v32 = vld [vmem:[#allocation5 + $0x1e4] ss:$16 sps:$4 sm:$0xff]   ;;  %v3483_v34 = vld [vmem:[#allocation5 + $0x1e0] ss:$16 sps:$4 sm:$0xff]   ;;  %v3538_v17 = vld [vmem:[#allocation5 + $0xec] ss:$16 sps:$4 sm:$0xff]  }
  0x4f   :  { %v3481_v33 = vld [vmem:[#allocation5 + $0x3e4] ss:$16 sps:$4 sm:$0xff]   ;;  %v3484_v35 = vld [vmem:[#allocation5 + $0x3e0] ss:$16 sps:$4 sm:$0xff]  }
  0x50   :  { %1326 = vmatpush1.bf16.msra.mxu0 %v3459_v18  ;;  %v3485_v36 = vld [vmem:[#allocation5 + $0x1c4] ss:$16 sps:$4 sm:$0xff]   ;;  %v3489_v38 = vld [vmem:[#allocation5 + $0x1c0] ss:$16 sps:$4 sm:$0xff]  }
  0x51   :  { %1369 = vmatpush1.bf16.msra.mxu1 %v3460_v19  ;;  %1327 = vmatprep.subr.bf16.mxu0 %v3461_v20  ;;  %v3487_v37 = vld [vmem:[#allocation5 + $0x3c4] ss:$16 sps:$4 sm:$0xff]   ;;  %v3490_v39 = vld [vmem:[#allocation5 + $0x3c0] ss:$16 sps:$4 sm:$0xff]   ;;  %v107_v20 = vld [vmem:[#allocation2 + $0x68] sm:$0xff] }
  0x52   :  { %1370 = vmatprep.subr.bf16.mxu1 %v3463_v21  ;;  %v3491_v40 = vld [vmem:[#allocation5 + $0x1a4] ss:$16 sps:$4 sm:$0xff]   ;;  %v3495_v42 = vld [vmem:[#allocation5 + $0x1a0] ss:$16 sps:$4 sm:$0xff]   ;;  %v4088_v21 = vmov 0  }
  0x53   :  { %v3493_v41 = vld [vmem:[#allocation5 + $0x3a4] ss:$16 sps:$4 sm:$0xff]   ;;  %v3496_v43 = vld [vmem:[#allocation5 + $0x3a0] ss:$16 sps:$4 sm:$0xff]  }
  0x54   :  { %1328 = vmatpush1.bf16.msra.mxu0 %v3465_v22  ;;  %v3497_v44 = vld [vmem:[#allocation5 + $0x184] ss:$16 sps:$4 sm:$0xff]   ;;  %v3501_v50 = vld [vmem:[#allocation5 + $0x180] ss:$16 sps:$4 sm:$0xff]  }
  0x55   :  { %1371 = vmatpush1.bf16.msra.mxu1 %v3466_v23  ;;  %1329 = vmatprep.subr.bf16.mxu0 %v3467_v24  ;;  %v3499_v45 = vld [vmem:[#allocation5 + $0x384] ss:$16 sps:$4 sm:$0xff]   ;;  %v3502_v51 = vld [vmem:[#allocation5 + $0x380] ss:$16 sps:$4 sm:$0xff]   ;;  %v3536_v24 = vld [vmem:[#allocation5 + $0xe8] ss:$16 sps:$4 sm:$0xff]  }
  0x56   :  { %1372 = vmatprep.subr.bf16.mxu1 %v3469_v25  ;;  %v102_v47 = vld [vmem:[#allocation2 + $0x40] sm:$0xff]  ;;  %v104_v49 = vld [vmem:[#allocation2 + $0x50] sm:$0xff] }
  0x57   :  { %v3503_v52 = vld [vmem:[#allocation5 + $0x164] ss:$16 sps:$4 sm:$0xff]   ;;  %v4147_v53 = vpack.c.bf16 %v102_v47, %v95_v46  ;;  %v4149_v54 = vpack.c.bf16 %v104_v49, %v97_v48  ;;  %v3507_v56 = vld [vmem:[#allocation5 + $0x160] ss:$16 sps:$4 sm:$0xff]   ;;  %v3566_v47 = vld [vmem:[#allocation5 + $0x48] ss:$16 sps:$4 sm:$0xff]  }
  0x58   :  { %1330 = vmatpush1.bf16.msra.mxu0 %v3471_v26  ;;  %v3505_v55 = vld [vmem:[#allocation5 + $0x364] ss:$16 sps:$4 sm:$0xff]   ;;  %v3508_v57 = vld [vmem:[#allocation5 + $0x360] ss:$16 sps:$4 sm:$0xff]   ;;  %v3544_v26 = vld [vmem:[#allocation5 + $0xcc] ss:$16 sps:$4 sm:$0xff]  }
  0x59   :  { %1373 = vmatpush1.bf16.msra.mxu1 %v3472_v27  ;;  %1331 = vmatprep.subr.bf16.mxu0 %v3473_v28  ;;  %v3509_v58 = vld [vmem:[#allocation5 + $0x144] ss:$16 sps:$4 sm:$0xff]   ;;  %v3513_v60 = vld [vmem:[#allocation5 + $0x140] ss:$16 sps:$4 sm:$0xff]   ;;  %v3542_v28 = vld [vmem:[#allocation5 + $0xc8] ss:$16 sps:$4 sm:$0xff]  }
  0x5a   :  { %1374 = vmatprep.subr.bf16.mxu1 %v3475_v29  ;;  %1349 = vmatprep.mubr.bf16.mxu0 %v4147_v53  ;;  %v3511_v59 = vld [vmem:[#allocation5 + $0x344] ss:$16 sps:$4 sm:$0xff]   ;;  %v3514_v61 = vld [vmem:[#allocation5 + $0x340] ss:$16 sps:$4 sm:$0xff]   ;;  %v3574_v49 = vld [vmem:[#allocation5 + $0x2c] ss:$16 sps:$4 sm:$0xff]  }
  0x5b   :  { %1392 = vmatprep.mubr.bf16.mxu1 %v4149_v54  ;;  %v3515_v62 = vld [vmem:[#allocation5 + $0x124] ss:$16 sps:$4 sm:$0xff]   ;;  %v3519_v0 = vld [vmem:[#allocation5 + $0x120] ss:$16 sps:$4 sm:$0xff]  }
  0x5c   :  { %1332 = vmatpush1.bf16.msra.mxu0 %v3477_v30  ;;  %v3517_v63 = vld [vmem:[#allocation5 + $0x324] ss:$16 sps:$4 sm:$0xff]   ;;  %v3520_v1 = vld [vmem:[#allocation5 + $0x320] ss:$16 sps:$4 sm:$0xff]   ;;  %v3550_v30 = vld [vmem:[#allocation5 + $0xac] ss:$16 sps:$4 sm:$0xff]  }
  0x5d   :  { %1375 = vmatpush1.bf16.msra.mxu1 %v3478_v31  ;;  %1333 = vmatprep.subr.bf16.mxu0 %v3479_v32  ;;  %v3521_v2 = vld [vmem:[#allocation5 + $0x104] ss:$16 sps:$4 sm:$0xff]   ;;  %v3525_v4 = vld [vmem:[#allocation5 + $0x100] ss:$16 sps:$4 sm:$0xff]   ;;  %v3548_v32 = vld [vmem:[#allocation5 + $0xa8] ss:$16 sps:$4 sm:$0xff]  }
  0x5e   :  { %1376 = vmatprep.subr.bf16.mxu1 %v3481_v33  ;;  %v3523_v3 = vld [vmem:[#allocation5 + $0x304] ss:$16 sps:$4 sm:$0xff]   ;;  %v3526_v5 = vld [vmem:[#allocation5 + $0x300] ss:$16 sps:$4 sm:$0xff]  }
  0x5f   :  { %v94_v6 = vld [vmem:[#allocation2] sm:$0xff]  ;;  %v96_v8 = vld [vmem:[#allocation2 + $0x10] sm:$0xff] }
  0x60   :  { %1334 = vmatpush2.bf16.msra.mxu0 %v3483_v34  ;;  %v3529_v10 = vld [vmem:[#allocation5 + $0x4e4] ss:$16 sps:$4 sm:$0xff]   ;;  %v4153_v12 = vpack.c.bf16 %v101_v7, %v94_v6  ;;  %v4155_v13 = vpack.c.bf16 %v103_v9, %v96_v8  ;;  %v3527_v14 = vld [vmem:[#allocation5 + $0x4e0] ss:$16 sps:$4 sm:$0xff]   ;;  %v3556_v34 = vld [vmem:[#allocation5 + $0x8c] ss:$16 sps:$4 sm:$0xff]  }
  0x61   :  { %1377 = vmatpush2.bf16.msra.mxu1 %v3484_v35  ;;  %1335 = vmatprep.subr.bf16.mxu0 %v3485_v36  ;;  %v3532_v11 = vld [vmem:[#allocation5 + $0x604] ss:$16 sps:$4 sm:$0xff]   ;;  %v3530_v15 = vld [vmem:[#allocation5 + $0x600] ss:$16 sps:$4 sm:$0xff]   ;;  %v3554_v36 = vld [vmem:[#allocation5 + $0x88] ss:$16 sps:$4 sm:$0xff]  }
  0x62   :  { %1378 = vmatprep.subr.bf16.mxu1 %v3487_v37  ;;  %v3535_v16 = vld [vmem:[#allocation5 + $0x4c4] ss:$16 sps:$4 sm:$0xff]   ;;  %v3533_v18 = vld [vmem:[#allocation5 + $0x4c0] ss:$16 sps:$4 sm:$0xff]   ;;  %v3604_v6 = vld [vmem:[#allocation5 + $0x18c] ss:$16 sps:$4 sm:$0xff]  }
  0x63   :  { %v100_v19 = vld [vmem:[#allocation2 + $0x30] sm:$0xff]  ;;  %v3602_v8 = vld [vmem:[#allocation5 + $0x188] ss:$16 sps:$4 sm:$0xff]  }
  0x64   :  { %1336 = vmatpush2.bf16.msra.mxu0 %v3489_v38  ;;  %v3541_v22 = vld [vmem:[#allocation5 + $0x4a4] ss:$16 sps:$4 sm:$0xff]   ;;  %v4160_v23 = vpack.c.bf16 %v107_v20, %v100_v19  ;;  %v3539_v25 = vld [vmem:[#allocation5 + $0x4a0] ss:$16 sps:$4 sm:$0xff]   ;;  %v3562_v38 = vld [vmem:[#allocation5 + $0x6c] ss:$16 sps:$4 sm:$0xff]  }
  0x65   :  { %1379 = vmatpush2.bf16.msra.mxu1 %v3490_v39  ;;  %1337 = vmatprep.subr.bf16.mxu0 %v3491_v40  ;;  %v3547_v27 = vld [vmem:[#allocation5 + $0x484] ss:$16 sps:$4 sm:$0xff]   ;;  %v3545_v29 = vld [vmem:[#allocation5 + $0x480] ss:$16 sps:$4 sm:$0xff]   ;;  %v3560_v40 = vld [vmem:[#allocation5 + $0x68] ss:$16 sps:$4 sm:$0xff]  }
  0x66   :  { %1380 = vmatprep.subr.bf16.mxu1 %v3493_v41  ;;  %v3553_v31 = vld [vmem:[#allocation5 + $0x464] ss:$16 sps:$4 sm:$0xff]   ;;  %v3551_v33 = vld [vmem:[#allocation5 + $0x460] ss:$16 sps:$4 sm:$0xff]   ;;  %v99_v41 = vld [vmem:[#allocation2 + $0x28] sm:$0xff] }
  0x67   :  { %v3559_v35 = vld [vmem:[#allocation5 + $0x444] ss:$16 sps:$4 sm:$0xff]   ;;  %v3557_v37 = vld [vmem:[#allocation5 + $0x440] ss:$16 sps:$4 sm:$0xff]  }
  0x68   :  { %1338 = vmatpush2.bf16.msra.mxu0 %v3495_v42  ;;  %v3565_v39 = vld [vmem:[#allocation5 + $0x424] ss:$16 sps:$4 sm:$0xff]   ;;  %v3569_v48 = vld [vmem:[#allocation5 + $0x400] ss:$16 sps:$4 sm:$0xff]  }
  0x69   :  { %1381 = vmatpush2.bf16.msra.mxu1 %v3496_v43  ;;  %1339 = vmatprep.subr.bf16.mxu0 %v3497_v44  ;;  %v106_v42 = vld [vmem:[#allocation2 + $0x60] sm:$0xff] }
  0x6a   :  { %1382 = vmatprep.subr.bf16.mxu1 %v3499_v45  ;;  %v3563_v43 = vld [vmem:[#allocation5 + $0x420] ss:$16 sps:$4 sm:$0xff]   ;;  %v4165_v44 = vpack.c.bf16 %v106_v42, %v99_v41  ;;  %v3568_v45 = vld [vmem:[#allocation5 + $0x4c] ss:$16 sps:$4 sm:$0xff]   ;;  %v3571_v46 = vld [vmem:[#allocation5 + $0x404] ss:$16 sps:$4 sm:$0xff]  }
  0x6b   :  { %v3607_v7 = vld [vmem:[#allocation5 + $0x544] ss:$16 sps:$4 sm:$0xff]   ;;  %v3605_v9 = vld [vmem:[#allocation5 + $0x540] ss:$16 sps:$4 sm:$0xff]   ;;  %v3646_v41 = vld [vmem:[#allocation5 + $0x4ac] ss:$16 sps:$4 sm:$0xff]  }
  0x6c   :  { %1340 = vmatpush2.bf16.msra.mxu0 %v3501_v50  ;;  %v3577_v50 = vld [vmem:[#allocation5 + $0x5e4] ss:$16 sps:$4 sm:$0xff]   ;;  %v3617_v19 = vld [vmem:[#allocation5 + $0x500] ss:$16 sps:$4 sm:$0xff]   ;;  %v3649_v42 = vld [vmem:[#allocation5 + $0x26c] ss:$16 sps:$4 sm:$0xff]  }
  0x6d   :  { %1383 = vmatpush2.bf16.msra.mxu1 %v3502_v51  ;;  %1341 = vmatprep.subr.bf16.mxu0 %v3503_v52  ;;  %v3572_v51 = vld [vmem:[#allocation5 + $0x28] ss:$16 sps:$4 sm:$0xff]   ;;  %v3575_v52 = vld [vmem:[#allocation5 + $0x5e0] ss:$16 sps:$4 sm:$0xff]  }
  0x6e   :  { %1384 = vmatprep.subr.bf16.mxu1 %v3505_v55  ;;  %v3583_v55 = vld [vmem:[#allocation5 + $0x5c4] ss:$16 sps:$4 sm:$0xff]  }
  0x6f   :  { %v98_v20 = vld [vmem:[#allocation2 + $0x20] sm:$0xff] }
  0x70   :  { %1342 = vmatpush2.bf16.msra.mxu0 %v3507_v56  ;;  %v3578_v56 = vld [vmem:[#allocation5 + $0x8] ss:$16 sps:$4 sm:$0xff]  }
  0x71   :  { %1385 = vmatpush2.bf16.msra.mxu1 %v3508_v57  ;;  %1343 = vmatprep.subr.bf16.mxu0 %v3509_v58  ;;  %v3581_v57 = vld [vmem:[#allocation5 + $0x5c0] ss:$16 sps:$4 sm:$0xff]   ;;  %v3586_v58 = vld [vmem:[#allocation5 + $0x1ec] ss:$16 sps:$4 sm:$0xff]  }
  0x72   :  { %1386 = vmatprep.subr.bf16.mxu1 %v3511_v59  ;;  %v3589_v59 = vld [vmem:[#allocation5 + $0x5a4] ss:$16 sps:$4 sm:$0xff]  }
  0x74   :  { %1344 = vmatpush2.bf16.msra.mxu0 %v3513_v60  ;;  %v3584_v60 = vld [vmem:[#allocation5 + $0x1e8] ss:$16 sps:$4 sm:$0xff]  }
  0x75   :  { %1387 = vmatpush2.bf16.msra.mxu1 %v3514_v61  ;;  %1345 = vmatprep.subr.bf16.mxu0 %v3515_v62  ;;  %v3587_v61 = vld [vmem:[#allocation5 + $0x5a0] ss:$16 sps:$4 sm:$0xff]   ;;  %v3592_v62 = vld [vmem:[#allocation5 + $0x1cc] ss:$16 sps:$4 sm:$0xff]  }
  0x76   :  { %1388 = vmatprep.subr.bf16.mxu1 %v3517_v63  ;;  %v3595_v63 = vld [vmem:[#allocation5 + $0x584] ss:$16 sps:$4 sm:$0xff]  }
  0x78   :  { %1346 = vmatpush2.bf16.msra.mxu0 %v3519_v0  ;;  %v3590_v0 = vld [vmem:[#allocation5 + $0x1c8] ss:$16 sps:$4 sm:$0xff]  }
  0x79   :  { %1389 = vmatpush2.bf16.msra.mxu1 %v3520_v1  ;;  %1347 = vmatprep.subr.bf16.mxu0 %v3521_v2  ;;  %v3593_v1 = vld [vmem:[#allocation5 + $0x580] ss:$16 sps:$4 sm:$0xff]   ;;  %v3598_v2 = vld [vmem:[#allocation5 + $0x1ac] ss:$16 sps:$4 sm:$0xff]  }
  0x7a   :  { %1390 = vmatprep.subr.bf16.mxu1 %v3523_v3  ;;  %v3601_v3 = vld [vmem:[#allocation5 + $0x564] ss:$16 sps:$4 sm:$0xff]  }
  0x7c   :  { %1348 = vmatpush2.bf16.msra.mxu0 %v3525_v4  ;;  %v3596_v4 = vld [vmem:[#allocation5 + $0x1a8] ss:$16 sps:$4 sm:$0xff]  }
  0x7d   :  { %1391 = vmatpush2.bf16.msra.mxu1 %v3526_v5  ;;  %1403 = vmatprep.subr.bf16.mxu0 %v3529_v10  ;;  %v3599_v5 = vld [vmem:[#allocation5 + $0x560] ss:$16 sps:$4 sm:$0xff]   ;;  %v3610_v10 = vld [vmem:[#allocation5 + $0x16c] ss:$16 sps:$4 sm:$0xff]  }
  0x7e   :  { %1460 = vmatprep.subr.bf16.mxu1 %v3532_v11  ;;  %v3613_v11 = vld [vmem:[#allocation5 + $0x524] ss:$16 sps:$4 sm:$0xff]  }
  0x7f   :  { %1350 = vmatmul.mubr.bf16.vlgmr.msra.gmra.mxu0 %v4153_v12 }
  0x80   :  { %1393 = vmatmul.mubr.bf16.vlgmr.msra.gmra.mxu1 %v4155_v13  ;;  %1404 = vmatpush1.bf16.msra.mxu0 %v3527_v14  ;;  %v3608_v14 = vld [vmem:[#allocation5 + $0x168] ss:$16 sps:$4 sm:$0xff]  }
  0x81   :  { %1461 = vmatpush1.bf16.msra.mxu1 %v3530_v15  ;;  %1405 = vmatprep.subr.bf16.mxu0 %v3535_v16  ;;  %v3611_v15 = vld [vmem:[#allocation5 + $0x520] ss:$16 sps:$4 sm:$0xff]   ;;  %v3616_v16 = vld [vmem:[#allocation5 + $0x14c] ss:$16 sps:$4 sm:$0xff]  }
  0x82   :  { %1478 = vmatprep.mubr.bf16.mxu1 %v4088_v21  ;;  %1489 = vmatprep.subr.bf16.mxu1 %v3538_v17  ;;  %v3619_v17 = vld [vmem:[#allocation5 + $0x504] ss:$16 sps:$4 sm:$0xff]  }
  0x83   :  { %1435 = vmatprep.mubr.bf16.mxu0 %v4165_v44 }
  0x84   :  { %1406 = vmatpush1.bf16.msra.mxu0 %v3533_v18  ;;  %v3614_v18 = vld [vmem:[#allocation5 + $0x148] ss:$16 sps:$4 sm:$0xff]  }
  0x85   :  { %1407 = vmatprep.subr.bf16.mxu0 %v3541_v22  ;;  %v105_v22 = vld [vmem:[#allocation2 + $0x58] sm:$0xff] }
  0x88   :  { %3209 = vmatmul.mubr.msk.bf16.vlgmr.msra.gmra.mxu1 %vm1313_vm0, %v4160_v23  ;;  %1408 = vmatpush1.bf16.msra.mxu0 %v3539_v25  ;;  %v3625_v25 = vld [vmem:[#allocation5 + $0x2ec] ss:$16 sps:$4 sm:$0xff]  }
  0x89   :  { %1490 = vmatpush1.bf16.msra.mxu1 %v3536_v24  ;;  %1409 = vmatprep.subr.bf16.mxu0 %v3547_v27  ;;  %v3622_v24 = vld [vmem:[#allocation5 + $0x12c] ss:$16 sps:$4 sm:$0xff]   ;;  %v3620_v27 = vld [vmem:[#allocation5 + $0x128] ss:$16 sps:$4 sm:$0xff]  }
  0x8a   :  { %1491 = vmatprep.subr.bf16.mxu1 %v3544_v26  ;;  %1521 = vmatprep.mubr.bf16.mxu1 %v4147_v53  ;;  %v3580_v53 = vld [vmem:[#allocation5 + $0xc] ss:$16 sps:$4 sm:$0xff]   ;;  %v4168_v26 = vpack.c.bf16 %v105_v22, %v98_v20  ;;  %v3704_v20 = vld [vmem:[#allocation5 + $0x568] ss:$16 sps:$4 sm:$0xff]  }
  0x8b   :  { %v3707_v22 = vld [vmem:[#allocation5 + $0x328] ss:$16 sps:$4 sm:$0xff]  }
  0x8c   :  { %1410 = vmatpush1.bf16.msra.mxu0 %v3545_v29  ;;  %v3628_v29 = vld [vmem:[#allocation5 + $0x10c] ss:$16 sps:$4 sm:$0xff]  }
  0x8d   :  { %1492 = vmatpush1.bf16.msra.mxu1 %v3542_v28  ;;  %1411 = vmatprep.subr.bf16.mxu0 %v3553_v31  ;;  %v3623_v28 = vld [vmem:[#allocation5 + $0x2e8] ss:$16 sps:$4 sm:$0xff]  }
  0x8e   :  { %1493 = vmatprep.subr.bf16.mxu1 %v3550_v30  ;;  %v3631_v30 = vld [vmem:[#allocation5 + $0x2cc] ss:$16 sps:$4 sm:$0xff]   ;;  %v3626_v31 = vld [vmem:[#allocation5 + $0x108] ss:$16 sps:$4 sm:$0xff]  }
  0x90   :  { %1412 = vmatpush1.bf16.msra.mxu0 %v3551_v33  ;;  %v3634_v33 = vld [vmem:[#allocation5 + $0x4ec] ss:$16 sps:$4 sm:$0xff]  }
  0x91   :  { %1494 = vmatpush1.bf16.msra.mxu1 %v3548_v32  ;;  %1413 = vmatprep.subr.bf16.mxu0 %v3559_v35  ;;  %v3629_v32 = vld [vmem:[#allocation5 + $0x2c8] ss:$16 sps:$4 sm:$0xff]  }
  0x92   :  { %1495 = vmatprep.subr.bf16.mxu1 %v3556_v34  ;;  %v3637_v34 = vld [vmem:[#allocation5 + $0x2ac] ss:$16 sps:$4 sm:$0xff]   ;;  %v3632_v35 = vld [vmem:[#allocation5 + $0x4e8] ss:$16 sps:$4 sm:$0xff]  }
  0x94   :  { %1414 = vmatpush1.bf16.msra.mxu0 %v3557_v37  ;;  %v3640_v37 = vld [vmem:[#allocation5 + $0x4cc] ss:$16 sps:$4 sm:$0xff]  }
  0x95   :  { %1496 = vmatpush1.bf16.msra.mxu1 %v3554_v36  ;;  %1415 = vmatprep.subr.bf16.mxu0 %v3565_v39  ;;  %v3635_v36 = vld [vmem:[#allocation5 + $0x2a8] ss:$16 sps:$4 sm:$0xff]  }
  0x96   :  { %1497 = vmatprep.subr.bf16.mxu1 %v3562_v38  ;;  %v3643_v38 = vld [vmem:[#allocation5 + $0x28c] ss:$16 sps:$4 sm:$0xff]   ;;  %v3638_v39 = vld [vmem:[#allocation5 + $0x4c8] ss:$16 sps:$4 sm:$0xff]  }
  0x98   :  { %1416 = vmatpush1.bf16.msra.mxu0 %v3563_v43  ;;  %v3644_v43 = vld [vmem:[#allocation5 + $0x4a8] ss:$16 sps:$4 sm:$0xff]  }
  0x99   :  { %1498 = vmatpush1.bf16.msra.mxu1 %v3560_v40  ;;  %1417 = vmatprep.subr.bf16.mxu0 %v3571_v46  ;;  %v3641_v40 = vld [vmem:[#allocation5 + $0x288] ss:$16 sps:$4 sm:$0xff]   ;;  %v3655_v46 = vld [vmem:[#allocation5 + $0x24c] ss:$16 sps:$4 sm:$0xff]  }
  0x9a   :  { %1499 = vmatprep.subr.bf16.mxu1 %v3568_v45  ;;  %v3647_v45 = vld [vmem:[#allocation5 + $0x268] ss:$16 sps:$4 sm:$0xff]  }
  0x9c   :  { %1418 = vmatpush1.bf16.msra.mxu0 %v3569_v48  ;;  %v3658_v48 = vld [vmem:[#allocation5 + $0x46c] ss:$16 sps:$4 sm:$0xff]  }
  0x9d   :  { %1500 = vmatpush1.bf16.msra.mxu1 %v3566_v47  ;;  %1419 = vmatprep.subr.bf16.mxu0 %v3577_v50  ;;  %v3650_v47 = vld [vmem:[#allocation5 + $0x488] ss:$16 sps:$4 sm:$0xff]  }
  0x9e   :  { %1501 = vmatprep.subr.bf16.mxu1 %v3574_v49  ;;  %v3661_v49 = vld [vmem:[#allocation5 + $0x22c] ss:$16 sps:$4 sm:$0xff]   ;;  %v3656_v50 = vld [vmem:[#allocation5 + $0x468] ss:$16 sps:$4 sm:$0xff]  }
  0xa0   :  { %1420 = vmatpush2.bf16.msra.mxu0 %v3575_v52  ;;  %v3667_v52 = vld [vmem:[#allocation5 + $0x20c] ss:$16 sps:$4 sm:$0xff]  }
  0xa1   :  { %1502 = vmatpush1.bf16.msra.mxu1 %v3572_v51  ;;  %1421 = vmatprep.subr.bf16.mxu0 %v3583_v55  ;;  %v3659_v51 = vld [vmem:[#allocation5 + $0x228] ss:$16 sps:$4 sm:$0xff]  }
  0xa2   :  { %1503 = vmatprep.subr.bf16.mxu1 %v3580_v53  ;;  %v3662_v53 = vld [vmem:[#allocation5 + $0x448] ss:$16 sps:$4 sm:$0xff]  }
  0xa3   :  { %v3665_v55 = vld [vmem:[#allocation5 + $0x208] ss:$16 sps:$4 sm:$0xff]  }
  0xa4   :  { %1422 = vmatpush2.bf16.msra.mxu0 %v3581_v57  ;;  %v3673_v57 = vld [vmem:[#allocation5 + $0x3ec] ss:$16 sps:$4 sm:$0xff]  }
  0xa5   :  { %1504 = vmatpush1.bf16.msra.mxu1 %v3578_v56  ;;  %1423 = vmatprep.subr.bf16.mxu0 %v3589_v59  ;;  %v3670_v56 = vld [vmem:[#allocation5 + $0x42c] ss:$16 sps:$4 sm:$0xff]   ;;  %v3671_v59 = vld [vmem:[#allocation5 + $0x3e8] ss:$16 sps:$4 sm:$0xff]  }
  0xa6   :  { %1505 = vmatprep.subr.bf16.mxu1 %v3586_v58  ;;  %v3668_v58 = vld [vmem:[#allocation5 + $0x428] ss:$16 sps:$4 sm:$0xff]  }
  0xa8   :  { %1424 = vmatpush2.bf16.msra.mxu0 %v3587_v61  ;;  %v3679_v61 = vld [vmem:[#allocation5 + $0x3cc] ss:$16 sps:$4 sm:$0xff]  }
  0xa9   :  { %1506 = vmatpush2.bf16.msra.mxu1 %v3584_v60  ;;  %1425 = vmatprep.subr.bf16.mxu0 %v3595_v63  ;;  %v3676_v60 = vld [vmem:[#allocation5 + $0x40c] ss:$16 sps:$4 sm:$0xff]   ;;  %v3677_v63 = vld [vmem:[#allocation5 + $0x3c8] ss:$16 sps:$4 sm:$0xff]  }
  0xaa   :  { %1507 = vmatprep.subr.bf16.mxu1 %v3592_v62  ;;  %v3674_v62 = vld [vmem:[#allocation5 + $0x408] ss:$16 sps:$4 sm:$0xff]  }
  0xac   :  { %1426 = vmatpush2.bf16.msra.mxu0 %v3593_v1  ;;  %v3685_v1 = vld [vmem:[#allocation5 + $0x3ac] ss:$16 sps:$4 sm:$0xff]  }
  0xad   :  { %1508 = vmatpush2.bf16.msra.mxu1 %v3590_v0  ;;  %1427 = vmatprep.subr.bf16.mxu0 %v3601_v3  ;;  %v3682_v0 = vld [vmem:[#allocation5 + $0x5ec] ss:$16 sps:$4 sm:$0xff]   ;;  %v3683_v3 = vld [vmem:[#allocation5 + $0x3a8] ss:$16 sps:$4 sm:$0xff]  }
  0xae   :  { %1509 = vmatprep.subr.bf16.mxu1 %v3598_v2  ;;  %v3680_v2 = vld [vmem:[#allocation5 + $0x5e8] ss:$16 sps:$4 sm:$0xff]  }
  0xb0   :  { %1428 = vmatpush2.bf16.msra.mxu0 %v3599_v5  ;;  %v3691_v5 = vld [vmem:[#allocation5 + $0x38c] ss:$16 sps:$4 sm:$0xff]  }
  0xb1   :  { %1510 = vmatpush2.bf16.msra.mxu1 %v3596_v4  ;;  %1429 = vmatprep.subr.bf16.mxu0 %v3607_v7  ;;  %v3688_v4 = vld [vmem:[#allocation5 + $0x5cc] ss:$16 sps:$4 sm:$0xff]   ;;  %v3689_v7 = vld [vmem:[#allocation5 + $0x388] ss:$16 sps:$4 sm:$0xff]  }
  0xb2   :  { %1511 = vmatprep.subr.bf16.mxu1 %v3604_v6  ;;  %v3686_v6 = vld [vmem:[#allocation5 + $0x5c8] ss:$16 sps:$4 sm:$0xff]  }
  0xb4   :  { %1430 = vmatpush2.bf16.msra.mxu0 %v3605_v9  ;;  %v3697_v9 = vld [vmem:[#allocation5 + $0x36c] ss:$16 sps:$4 sm:$0xff]  }
  0xb5   :  { %1512 = vmatpush2.bf16.msra.mxu1 %v3602_v8  ;;  %1431 = vmatprep.subr.bf16.mxu0 %v3613_v11  ;;  %v3694_v8 = vld [vmem:[#allocation5 + $0x5ac] ss:$16 sps:$4 sm:$0xff]   ;;  %v3695_v11 = vld [vmem:[#allocation5 + $0x368] ss:$16 sps:$4 sm:$0xff]  }
  0xb6   :  { %1513 = vmatprep.subr.bf16.mxu1 %v3610_v10  ;;  %v3692_v10 = vld [vmem:[#allocation5 + $0x5a8] ss:$16 sps:$4 sm:$0xff]  }
  0xb8   :  { %1432 = vmatpush2.bf16.msra.mxu0 %v3611_v15  ;;  %v3703_v15 = vld [vmem:[#allocation5 + $0x34c] ss:$16 sps:$4 sm:$0xff]  }
  0xb9   :  { %1514 = vmatpush2.bf16.msra.mxu1 %v3608_v14  ;;  %1433 = vmatprep.subr.bf16.mxu0 %v3619_v17  ;;  %v3700_v14 = vld [vmem:[#allocation5 + $0x58c] ss:$16 sps:$4 sm:$0xff]   ;;  %v3701_v17 = vld [vmem:[#allocation5 + $0x348] ss:$16 sps:$4 sm:$0xff]  }
  0xba   :  { %1515 = vmatprep.subr.bf16.mxu1 %v3616_v16  ;;  %v3698_v16 = vld [vmem:[#allocation5 + $0x588] ss:$16 sps:$4 sm:$0xff]  }
  0xbc   :  { %1434 = vmatpush2.bf16.msra.mxu0 %v3617_v19  ;;  %v3709_v19 = vld [vmem:[#allocation5 + $0x32c] ss:$16 sps:$4 sm:$0xff]  }
  0xbd   :  { %1516 = vmatpush2.bf16.msra.mxu1 %v3614_v18  ;;  %1532 = vmatprep.subr.bf16.mxu0 %v3625_v25  ;;  %v3706_v18 = vld [vmem:[#allocation5 + $0x56c] ss:$16 sps:$4 sm:$0xff]  }
  0xbe   :  { %1517 = vmatprep.subr.bf16.mxu1 %v3622_v24  ;;  %v3712_v24 = vld [vmem:[#allocation5 + $0x54c] ss:$16 sps:$4 sm:$0xff]  }
  0xbf   :  { %1436 = vmatmul.mubr.bf16.vlgmr.msra.gmra.mxu0 %v4168_v26  ;;  %v3715_v25 = vld [vmem:[#allocation5 + $0x30c] ss:$16 sps:$4 sm:$0xff]  }
  0xc0   :  { %1533 = vmatpush1.bf16.msra.mxu0 %v3623_v28  ;;  %1564 = vmatprep.mubr.bf16.mxu0 %v4149_v54  ;;  %v3652_v54 = vld [vmem:[#allocation5 + $0x48c] ss:$16 sps:$4 sm:$0xff]   ;;  %v3713_v28 = vld [vmem:[#allocation5 + $0x308] ss:$16 sps:$4 sm:$0xff]  }
  0xc1   :  { %1518 = vmatpush2.bf16.msra.mxu1 %v3620_v27  ;;  %1534 = vmatprep.subr.bf16.mxu0 %v3631_v30  ;;  %v3710_v27 = vld [vmem:[#allocation5 + $0x548] ss:$16 sps:$4 sm:$0xff]   ;;  %v3721_v30 = vld [vmem:[#allocation5 + $0x60c] ss:$16 sps:$4 sm:$0xff]  }
  0xc2   :  { %1519 = vmatprep.subr.bf16.mxu1 %v3628_v29  ;;  %v3718_v29 = vld [vmem:[#allocation5 + $0x52c] ss:$16 sps:$4 sm:$0xff]  }
  0xc4   :  { %1535 = vmatpush1.bf16.msra.mxu0 %v3629_v32  ;;  %v3719_v32 = vld [vmem:[#allocation5 + $0x608] ss:$16 sps:$4 sm:$0xff]  }
  0xc5   :  { %1520 = vmatpush2.bf16.msra.mxu1 %v3626_v31  ;;  %1536 = vmatprep.subr.bf16.mxu0 %v3637_v34  ;;  %v3716_v31 = vld [vmem:[#allocation5 + $0x528] ss:$16 sps:$4 sm:$0xff]  }
  0xc6   :  { %1575 = vmatprep.subr.bf16.mxu1 %v3634_v33  ;;  %v3724_v33 = vld [vmem:[#allocation5 + $0x50c] ss:$16 sps:$4 sm:$0xff]   ;;  %v3727_v34 = vld [vmem:[#allocation8 + $0xe4] ss:$16 sps:$4 sm:$0xff]  }
  0xc8   :  { %1522 = vmatmul.mubr.bf16.vlgmr.msra.gmra.mxu1 %v4153_v12  ;;  %1537 = vmatpush1.bf16.msra.mxu0 %v3635_v36  ;;  %v3653_v12 = vld [vmem:[#allocation5 + $0x248] ss:$16 sps:$4 sm:$0xff]   ;;  %v3725_v36 = vld [vmem:[#allocation8 + $0xe0] ss:$16 sps:$4 sm:$0xff]  }
  0xc9   :  { %1576 = vmatpush1.bf16.msra.mxu1 %v3632_v35  ;;  %1538 = vmatprep.subr.bf16.mxu0 %v3643_v38  ;;  %v3722_v35 = vld [vmem:[#allocation5 + $0x508] ss:$16 sps:$4 sm:$0xff]   ;;  %v3728_v38 = vld [vmem:[#allocation8 + $0xc0] ss:$16 sps:$4 sm:$0xff]  }
  0xca   :  { %1577 = vmatprep.subr.bf16.mxu1 %v3640_v37  ;;  %1607 = vmatprep.mubr.bf16.mxu1 %v4165_v44  ;;  %v3664_v44 = vld [vmem:[#allocation5 + $0x44c] ss:$16 sps:$4 sm:$0xff]   ;;  %v3730_v37 = vld [vmem:[#allocation8 + $0xc4] ss:$16 sps:$4 sm:$0xff]  }
  0xcc   :  { %1539 = vmatpush1.bf16.msra.mxu0 %v3641_v40  ;;  %v3731_v40 = vld [vmem:[#allocation8 + $0xa0] ss:$16 sps:$4 sm:$0xff]  }
  0xcd   :  { %1578 = vmatpush1.bf16.msra.mxu1 %v3638_v39  ;;  %1540 = vmatprep.subr.bf16.mxu0 %v3649_v42  ;;  %v3733_v39 = vld [vmem:[#allocation8 + $0xa4] ss:$16 sps:$4 sm:$0xff]   ;;  %v3737_v42 = vld [vmem:[#allocation8 + $0x60] ss:$16 sps:$4 sm:$0xff]  }
  0xce   :  { %1579 = vmatprep.subr.bf16.mxu1 %v3646_v41  ;;  %v3734_v41 = vld [vmem:[#allocation8 + $0x80] ss:$16 sps:$4 sm:$0xff]  }
  0xd0   :  { %1541 = vmatpush1.bf16.msra.mxu0 %v3647_v45  ;;  %v3781_v45 = vld [vmem:[#allocation8 + $0x2e4] ss:$16 sps:$4 sm:$0xff]  }
  0xd1   :  { %1580 = vmatpush1.bf16.msra.mxu1 %v3644_v43  ;;  %1542 = vmatprep.subr.bf16.mxu0 %v3655_v46  ;;  %v3779_v43 = vld [vmem:[#allocation8 + $0x2e0] ss:$16 sps:$4 sm:$0xff]   ;;  %v3787_v46 = vld [vmem:[#allocation8 + $0x2c4] ss:$16 sps:$4 sm:$0xff]  }
  0xd2   :  { %1581 = vmatprep.subr.bf16.mxu1 %v3652_v54  ;;  %v3785_v54 = vld [vmem:[#allocation8 + $0x2c0] ss:$16 sps:$4 sm:$0xff]  }
  0xd4   :  { %1543 = vmatpush1.bf16.msra.mxu0 %v3653_v12  ;;  %v3743_v12 = vld [vmem:[#allocation8 + $0x20] ss:$16 sps:$4 sm:$0xff]  }
  0xd5   :  { %1582 = vmatpush1.bf16.msra.mxu1 %v3650_v47  ;;  %1544 = vmatprep.subr.bf16.mxu0 %v3661_v49  ;;  %v3745_v47 = vld [vmem:[#allocation8 + $0x24] ss:$16 sps:$4 sm:$0xff]  }
  0xd6   :  { %1583 = vmatprep.subr.bf16.mxu1 %v3658_v48  ;;  %v3791_v48 = vld [vmem:[#allocation8 + $0x2a0] ss:$16 sps:$4 sm:$0xff]   ;;  %v3793_v49 = vld [vmem:[#allocation8 + $0x2a4] ss:$16 sps:$4 sm:$0xff]  }
  0xd8   :  { %1545 = vmatpush1.bf16.msra.mxu0 %v3659_v51  ;;  %v3746_v51 = vld [vmem:[#allocation8] ss:$16 sps:$4 sm:$0xff]  }
  0xd9   :  { %1584 = vmatpush1.bf16.msra.mxu1 %v3656_v50  ;;  %1546 = vmatprep.subr.bf16.mxu0 %v3667_v52  ;;  %v3748_v50 = vld [vmem:[#allocation8 + $0x4] ss:$16 sps:$4 sm:$0xff]  }
  0xda   :  { %1585 = vmatprep.subr.bf16.mxu1 %v3664_v44  ;;  %v3797_v44 = vld [vmem:[#allocation8 + $0x280] ss:$16 sps:$4 sm:$0xff]   ;;  %v3799_v52 = vld [vmem:[#allocation8 + $0x284] ss:$16 sps:$4 sm:$0xff]  }
  0xdc   :  { %1547 = vmatpush1.bf16.msra.mxu0 %v3665_v55  ;;  %v3749_v55 = vld [vmem:[#allocation8 + $0x1e0] ss:$16 sps:$4 sm:$0xff]  }
  0xdd   :  { %1586 = vmatpush1.bf16.msra.mxu1 %v3662_v53  ;;  %1548 = vmatprep.subr.bf16.mxu0 %v3673_v57  ;;  %v3751_v53 = vld [vmem:[#allocation8 + $0x1e4] ss:$16 sps:$4 sm:$0xff]  }
  0xde   :  { %1587 = vmatprep.subr.bf16.mxu1 %v3670_v56  ;;  %v3803_v56 = vld [vmem:[#allocation8 + $0x260] ss:$16 sps:$4 sm:$0xff]   ;;  %v3805_v57 = vld [vmem:[#allocation8 + $0x264] ss:$16 sps:$4 sm:$0xff]  }
  0xe0   :  { %1549 = vmatpush2.bf16.msra.mxu0 %v3671_v59  ;;  %v3752_v59 = vld [vmem:[#allocation8 + $0x1c0] ss:$16 sps:$4 sm:$0xff]  }
  0xe1   :  { %1588 = vmatpush1.bf16.msra.mxu1 %v3668_v58  ;;  %1550 = vmatprep.subr.bf16.mxu0 %v3679_v61  ;;  %v3754_v58 = vld [vmem:[#allocation8 + $0x1c4] ss:$16 sps:$4 sm:$0xff]  }
  0xe2   :  { %1589 = vmatprep.subr.bf16.mxu1 %v3676_v60  ;;  %v3809_v60 = vld [vmem:[#allocation8 + $0x240] ss:$16 sps:$4 sm:$0xff]   ;;  %v3811_v61 = vld [vmem:[#allocation8 + $0x244] ss:$16 sps:$4 sm:$0xff]  }
  0xe4   :  { %1551 = vmatpush2.bf16.msra.mxu0 %v3677_v63  ;;  %v3755_v63 = vld [vmem:[#allocation8 + $0x1a0] ss:$16 sps:$4 sm:$0xff]  }
  0xe5   :  { %1590 = vmatpush1.bf16.msra.mxu1 %v3674_v62  ;;  %1552 = vmatprep.subr.bf16.mxu0 %v3685_v1  ;;  %v3757_v62 = vld [vmem:[#allocation8 + $0x1a4] ss:$16 sps:$4 sm:$0xff]  }
  0xe6   :  { %1591 = vmatprep.subr.bf16.mxu1 %v3682_v0  ;;  %v3815_v0 = vld [vmem:[#allocation8 + $0x220] ss:$16 sps:$4 sm:$0xff]   ;;  %v3817_v1 = vld [vmem:[#allocation8 + $0x224] ss:$16 sps:$4 sm:$0xff]  }
  0xe8   :  { %1553 = vmatpush2.bf16.msra.mxu0 %v3683_v3  ;;  %v3758_v3 = vld [vmem:[#allocation8 + $0x180] ss:$16 sps:$4 sm:$0xff]  }
  0xe9   :  { %1592 = vmatpush2.bf16.msra.mxu1 %v3680_v2  ;;  %1554 = vmatprep.subr.bf16.mxu0 %v3691_v5  ;;  %v3760_v2 = vld [vmem:[#allocation8 + $0x184] ss:$16 sps:$4 sm:$0xff]  }
  0xea   :  { %1593 = vmatprep.subr.bf16.mxu1 %v3688_v4  ;;  %v3821_v4 = vld [vmem:[#allocation8 + $0x200] ss:$16 sps:$4 sm:$0xff]   ;;  %v3823_v5 = vld [vmem:[#allocation8 + $0x204] ss:$16 sps:$4 sm:$0xff]  }
  0xec   :  { %1555 = vmatpush2.bf16.msra.mxu0 %v3689_v7  ;;  %v3761_v7 = vld [vmem:[#allocation8 + $0x160] ss:$16 sps:$4 sm:$0xff]  }
  0xed   :  { %1594 = vmatpush2.bf16.msra.mxu1 %v3686_v6  ;;  %1556 = vmatprep.subr.bf16.mxu0 %v3697_v9  ;;  %v3763_v6 = vld [vmem:[#allocation8 + $0x164] ss:$16 sps:$4 sm:$0xff]  }
  0xee   :  { %1595 = vmatprep.subr.bf16.mxu1 %v3694_v8  ;;  %v3827_v8 = vld [vmem:[#allocation8 + $0x3e0] ss:$16 sps:$4 sm:$0xff]   ;;  %v3829_v9 = vld [vmem:[#allocation8 + $0x3e4] ss:$16 sps:$4 sm:$0xff]  }
  0xf0   :  { %1557 = vmatpush2.bf16.msra.mxu0 %v3695_v11  ;;  %v3764_v11 = vld [vmem:[#allocation8 + $0x140] ss:$16 sps:$4 sm:$0xff]  }
  0xf1   :  { %1596 = vmatpush2.bf16.msra.mxu1 %v3692_v10  ;;  %1558 = vmatprep.subr.bf16.mxu0 %v3703_v15  ;;  %v3766_v10 = vld [vmem:[#allocation8 + $0x144] ss:$16 sps:$4 sm:$0xff]  }
  0xf2   :  { %1597 = vmatprep.subr.bf16.mxu1 %v3700_v14  ;;  %v3833_v14 = vld [vmem:[#allocation8 + $0x3c0] ss:$16 sps:$4 sm:$0xff]   ;;  %v3835_v15 = vld [vmem:[#allocation8 + $0x3c4] ss:$16 sps:$4 sm:$0xff]  }
  0xf4   :  { %1559 = vmatpush2.bf16.msra.mxu0 %v3701_v17  ;;  %v3767_v17 = vld [vmem:[#allocation8 + $0x120] ss:$16 sps:$4 sm:$0xff]  }
  0xf5   :  { %1598 = vmatpush2.bf16.msra.mxu1 %v3698_v16  ;;  %1560 = vmatprep.subr.bf16.mxu0 %v3709_v19  ;;  %v3769_v16 = vld [vmem:[#allocation8 + $0x124] ss:$16 sps:$4 sm:$0xff]  }
  0xf6   :  { %1599 = vmatprep.subr.bf16.mxu1 %v3706_v18  ;;  %v3839_v18 = vld [vmem:[#allocation8 + $0x3a0] ss:$16 sps:$4 sm:$0xff]   ;;  %v3841_v19 = vld [vmem:[#allocation8 + $0x3a4] ss:$16 sps:$4 sm:$0xff]  }
  0xf8   :  { %1561 = vmatpush2.bf16.msra.mxu0 %v3707_v22  ;;  %v3770_v22 = vld [vmem:[#allocation8 + $0x100] ss:$16 sps:$4 sm:$0xff]  }
  0xf9   :  { %1600 = vmatpush2.bf16.msra.mxu1 %v3704_v20  ;;  %1562 = vmatprep.subr.bf16.mxu0 %v3715_v25  ;;  %v3772_v20 = vld [vmem:[#allocation8 + $0x104] ss:$16 sps:$4 sm:$0xff]   ;;  %v3775_v25 = vld [vmem:[#allocation8 + $0xec] ss:$16 sps:$4 sm:$0xff]  }
  0xfa   :  { %1601 = vmatprep.subr.bf16.mxu1 %v3712_v24  ;;  %v3847_v24 = vld [vmem:[#allocation8 + $0x384] ss:$16 sps:$4 sm:$0xff]  }
  0xfc   :  { %1563 = vmatpush2.bf16.msra.mxu0 %v3713_v28  ;;  %v3853_v28 = vld [vmem:[#allocation8 + $0x364] ss:$16 sps:$4 sm:$0xff]  }
  0xfd   :  { %1602 = vmatpush2.bf16.msra.mxu1 %v3710_v27  ;;  %1632 = vmatprep.subr.bf16.mxu0 %v3721_v30  ;;  %v3845_v27 = vld [vmem:[#allocation8 + $0x380] ss:$16 sps:$4 sm:$0xff]   ;;  %v3859_v30 = vld [vmem:[#allocation8 + $0x344] ss:$16 sps:$4 sm:$0xff]  }
  0xfe   :  { %1603 = vmatprep.subr.bf16.mxu1 %v3718_v29  ;;  %v3851_v29 = vld [vmem:[#allocation8 + $0x360] ss:$16 sps:$4 sm:$0xff]  }
  0xff   :  { %1565 = vmatmul.mubr.bf16.vlgmr.msra.gmra.mxu0 %v4155_v13  ;;  %v3736_v13 = vld [vmem:[#allocation8 + $0x84] ss:$16 sps:$4 sm:$0xff]  }
 0x100   :  { %1633 = vmatpush1.bf16.msra.mxu0 %v3719_v32  ;;  %1650 = vmatprep.mubr.bf16.mxu0 %v4088_v21  ;;  %v3739_v21 = vld [vmem:[#allocation8 + $0x64] ss:$16 sps:$4 sm:$0xff]  }
 0x101   :  { %1604 = vmatpush2.bf16.msra.mxu1 %v3716_v31  ;;  %2463 = vmatprep.subr.bf16.mxu0 %v3727_v34  ;;  %v3857_v31 = vld [vmem:[#allocation8 + $0x340] ss:$16 sps:$4 sm:$0xff]   ;;  %v3865_v32 = vld [vmem:[#allocation8 + $0x324] ss:$16 sps:$4 sm:$0xff]  }
 0x102   :  { %1605 = vmatprep.subr.bf16.mxu1 %v3724_v33  ;;  %v3863_v33 = vld [vmem:[#allocation8 + $0x320] ss:$16 sps:$4 sm:$0xff]   ;;  %v3868_v34 = vld [vmem:[#allocation8 + $0x304] ss:$16 sps:$4 sm:$0xff]  }
 0x105   :  { %1606 = vmatpush2.bf16.msra.mxu1 %v3722_v35  ;;  %v3866_v35 = vld [vmem:[#allocation8 + $0x300] ss:$16 sps:$4 sm:$0xff]  }
 0x106   :  { %2506 = vmatprep.subr.bf16.mxu1 %v3781_v45  ;;  %v4183_v45 = vld [vmem:[#allocation7] sm:$0xf] }
 0x107   :  { %3210 = vmatmul.mubr.msk.bf16.vlgmr.msra.gmra.mxu0 %vm1313_vm0, %v4160_v23  ;;  %v3740_v23 = vld [vmem:[#allocation8 + $0x40] ss:$16 sps:$4 sm:$0xff]  }
 0x108   :  { %1608 = vmatmul.mubr.bf16.vlgmr.msra.gmra.mxu1 %v4168_v26  ;;  %2464 = vmatpush1.bf16.msra.mxu0 %v3725_v36  ;;  %v3742_v26 = vld [vmem:[#allocation8 + $0x44] ss:$16 sps:$4 sm:$0xff]   ;;  %v3871_v36 = vld [vmem:[#allocation8 + $0x2ec] ss:$16 sps:$4 sm:$0xff]  }
 0x109   :  { %2465 = vmatprep.subr.bf16.mxu0 %v3730_v37  ;;  %2507 = vmatpush1.bf16.msra.mxu1 %v3779_v43 }
 0x10a   :  { %2508 = vmatprep.subr.bf16.mxu1 %v3787_v46 }
 0x10c   :  { %2466 = vmatpush1.bf16.msra.mxu0 %v3728_v38  ;;  %v313_v38 = vlaneseq }
 0x10d   :  { %2467 = vmatprep.subr.bf16.mxu0 %v3733_v39  ;;  %2509 = vmatpush1.bf16.msra.mxu1 %v3785_v54 }
 0x10e   :  { %2510 = vmatprep.subr.bf16.mxu1 %v3793_v49 }
 0x110   :  { %2468 = vmatpush1.bf16.msra.mxu0 %v3731_v40  ;;  %v4179_v40 = vshrl.u32 %v313_v38, 7  ;;  %v3830_v38 = vld [vmem:[#allocation8 + $0x1a8] ss:$16 sps:$4 sm:$0xff]  }
 0x111   :  { %2469 = vmatprep.subr.bf16.mxu0 %v3736_v13  ;;  %2511 = vmatpush1.bf16.msra.mxu1 %v3791_v48 }
 0x112   :  { %2512 = vmatprep.subr.bf16.mxu1 %v3799_v52 }
 0x114   :  { %2470 = vmatpush1.bf16.msra.mxu0 %v3734_v41 }
 0x115   :  { %2471 = vmatprep.subr.bf16.mxu0 %v3739_v21  ;;  %2513 = vmatpush1.bf16.msra.mxu1 %v3797_v44  ;;  %v319_v21 = vsub.s32 1, %v4179_v40 }
 0x116   :  { %2514 = vmatprep.subr.bf16.mxu1 %v3805_v57 }
 0x118   :  { %2472 = vmatpush1.bf16.msra.mxu0 %v3737_v42  ;;  %v315_v42 = vsub.s32 0, %v4179_v40 }
 0x119   :  { %2473 = vmatprep.subr.bf16.mxu0 %v3742_v26  ;;  %2515 = vmatpush1.bf16.msra.mxu1 %v3803_v56 }
 0x11a   :  { %2516 = vmatprep.subr.bf16.mxu1 %v3811_v61  ;;  %v316_v54 = vrot.slane %v4183_v45, %v315_v42 }
 0x11c   :  { %2474 = vmatpush1.bf16.msra.mxu0 %v3740_v23  ;;  %v320_v23 = vrot.slane %v4183_v45, %v319_v21 }
 0x11d   :  { %2475 = vmatprep.subr.bf16.mxu0 %v3745_v47  ;;  %2517 = vmatpush1.bf16.msra.mxu1 %v3809_v60 }
 0x11e   :  { %2518 = vmatprep.subr.bf16.mxu1 %v3817_v1 }
 0x120   :  { %2476 = vmatpush1.bf16.msra.mxu0 %v3743_v12 }
 0x121   :  { %2477 = vmatprep.subr.bf16.mxu0 %v3748_v50  ;;  %2519 = vmatpush1.bf16.msra.mxu1 %v3815_v0 }
 0x122   :  { %2520 = vmatprep.subr.bf16.mxu1 %v3823_v5 }
 0x124   :  { %2478 = vmatpush1.bf16.msra.mxu0 %v3746_v51 }
 0x125   :  { %2479 = vmatprep.subr.bf16.mxu0 %v3751_v53  ;;  %2521 = vmatpush1.bf16.msra.mxu1 %v3821_v4 }
 0x126   :  { %2522 = vmatprep.subr.bf16.mxu1 %v3829_v9 }
 0x128   :  { %2480 = vmatpush2.bf16.msra.mxu0 %v3749_v55 }
 0x129   :  { %2481 = vmatprep.subr.bf16.mxu0 %v3754_v58  ;;  %2523 = vmatpush2.bf16.msra.mxu1 %v3827_v8 }
 0x12a   :  { %2524 = vmatprep.subr.bf16.mxu1 %v3835_v15 }
 0x12c   :  { %2482 = vmatpush2.bf16.msra.mxu0 %v3752_v59 }
 0x12d   :  { %2483 = vmatprep.subr.bf16.mxu0 %v3757_v62  ;;  %2525 = vmatpush2.bf16.msra.mxu1 %v3833_v14  ;;  %v3773_v14 = vld [vmem:[#allocation8 + $0xe8] ss:$16 sps:$4 sm:$0xff]  }
 0x12e   :  { %2526 = vmatprep.subr.bf16.mxu1 %v3841_v19  ;;  %v3782_v19 = vld [vmem:[#allocation8 + $0xa8] ss:$16 sps:$4 sm:$0xff]  }
 0x130   :  { %2484 = vmatpush2.bf16.msra.mxu0 %v3755_v63 }
 0x131   :  { %2485 = vmatprep.subr.bf16.mxu0 %v3760_v2  ;;  %2527 = vmatpush2.bf16.msra.mxu1 %v3839_v18  ;;  %v3784_v18 = vld [vmem:[#allocation8 + $0xac] ss:$16 sps:$4 sm:$0xff]  }
 0x132   :  { %2528 = vmatprep.subr.bf16.mxu1 %v3847_v24  ;;  %v3796_v24 = vld [vmem:[#allocation8 + $0x6c] ss:$16 sps:$4 sm:$0xff]  }
 0x134   :  { %2486 = vmatpush2.bf16.msra.mxu0 %v3758_v3 }
 0x135   :  { %2487 = vmatprep.subr.bf16.mxu0 %v3763_v6  ;;  %2529 = vmatpush2.bf16.msra.mxu1 %v3845_v27  ;;  %v3802_v27 = vld [vmem:[#allocation8 + $0x4c] ss:$16 sps:$4 sm:$0xff]  }
 0x136   :  { %2530 = vmatprep.subr.bf16.mxu1 %v3853_v28  ;;  %v3800_v28 = vld [vmem:[#allocation8 + $0x48] ss:$16 sps:$4 sm:$0xff]  }
 0x138   :  { %2488 = vmatpush2.bf16.msra.mxu0 %v3761_v7 }
 0x139   :  { %2489 = vmatprep.subr.bf16.mxu0 %v3766_v10  ;;  %2531 = vmatpush2.bf16.msra.mxu1 %v3851_v29  ;;  %v3808_v29 = vld [vmem:[#allocation8 + $0x2c] ss:$16 sps:$4 sm:$0xff]  }
 0x13a   :  { %2532 = vmatprep.subr.bf16.mxu1 %v3859_v30  ;;  %v3806_v30 = vld [vmem:[#allocation8 + $0x28] ss:$16 sps:$4 sm:$0xff]  }
 0x13c   :  { %2490 = vmatpush2.bf16.msra.mxu0 %v3764_v11 }
 0x13d   :  { %2491 = vmatprep.subr.bf16.mxu0 %v3769_v16  ;;  %2533 = vmatpush2.bf16.msra.mxu1 %v3857_v31  ;;  %v3778_v16 = vld [vmem:[#allocation8 + $0xcc] ss:$16 sps:$4 sm:$0xff]  }
 0x13e   :  { %2534 = vmatprep.subr.bf16.mxu1 %v3865_v32  ;;  %v3814_v31 = vld [vmem:[#allocation8 + $0xc] ss:$16 sps:$4 sm:$0xff]   ;;  %v3812_v32 = vld [vmem:[#allocation8 + $0x8] ss:$16 sps:$4 sm:$0xff]  }
 0x13f   :  { %v1351_v13 = vpop.f32.mrf.mxu0 }
 0x140   :  { %2492 = vmatpush2.bf16.msra.mxu0 %v3767_v17  ;;  %v1394_v37 = vpop.f32.mrf.mxu1  ;;  %v1352_v48 = vadd.f32 %v1351_v13, %v316_v54  ;;  %v3776_v17 = vld [vmem:[#allocation8 + $0xc8] ss:$16 sps:$4 sm:$0xff]  }
 0x141   :  { %2493 = vmatprep.subr.bf16.mxu0 %v3772_v20  ;;  %2535 = vmatpush2.bf16.msra.mxu1 %v3863_v33  ;;  %v1353_v43 = vpop.f32.mrf.mxu0  ;;  %v3790_v20 = vld [vmem:[#allocation8 + $0x8c] ss:$16 sps:$4 sm:$0xff]   ;;  %v3836_v13 = vld [vmem:[#allocation8 + $0x188] ss:$16 sps:$4 sm:$0xff]  }
 0x142   :  { %2536 = vmatprep.subr.bf16.mxu1 %v3868_v34  ;;  %v1396_v39 = vpop.f32.mrf.mxu1  ;;  %v1354_v12 = vadd.f32 %v1353_v43, %v320_v23  ;;  %v1395_v55 = vadd.f32 %v1394_v37, %v1352_v48  ;;  %v3820_v33 = vld [vmem:[#allocation8 + $0x1ec] ss:$16 sps:$4 sm:$0xff]   ;;  %v3818_v34 = vld [vmem:[#allocation8 + $0x1e8] ss:$16 sps:$4 sm:$0xff]  }
 0x143   :  { %v1355_v46 = vpop.f32.mrf.mxu0  ;;  %v3832_v37 = vld [vmem:[#allocation8 + $0x1ac] ss:$16 sps:$4 sm:$0xff]   ;;  %v3848_v48 = vld [vmem:[#allocation8 + $0x148] ss:$16 sps:$4 sm:$0xff]  }
 0x144   :  { %2494 = vmatpush2.bf16.msra.mxu0 %v3770_v22  ;;  %v1398_v41 = vpop.f32.mrf.mxu1  ;;  %v1356_v50 = vadd.f32 %v1355_v46, %v316_v54  ;;  %v1397_v52 = vadd.f32 %v1396_v39, %v1354_v12  ;;  %v3788_v22 = vld [vmem:[#allocation8 + $0x88] ss:$16 sps:$4 sm:$0xff]   ;;  %v3838_v39 = vld [vmem:[#allocation8 + $0x18c] ss:$16 sps:$4 sm:$0xff]   ;;  %v327_v46 = vsub.s32 3, %v4179_v40 }
 0x145   :  { %2549 = vmatprep.subr.bf16.mxu0 %v3775_v25  ;;  %2537 = vmatpush2.bf16.msra.mxu1 %v3866_v35  ;;  %v1357_v49 = vpop.f32.mrf.mxu0  ;;  %v3794_v25 = vld [vmem:[#allocation8 + $0x68] ss:$16 sps:$4 sm:$0xff]   ;;  %v3826_v35 = vld [vmem:[#allocation8 + $0x1cc] ss:$16 sps:$4 sm:$0xff]  }
 0x146   :  { %2592 = vmatprep.subr.bf16.mxu1 %v3871_v36  ;;  %v1400_v26 = vpop.f32.mrf.mxu1  ;;  %v1358_v53 = vadd.f32 %v1357_v49, %v320_v23  ;;  %v1399_v57 = vadd.f32 %v1398_v41, %v1356_v50  ;;  %v3824_v36 = vld [vmem:[#allocation8 + $0x1c8] ss:$16 sps:$4 sm:$0xff]   ;;  %v3844_v43 = vld [vmem:[#allocation8 + $0x16c] ss:$16 sps:$4 sm:$0xff]  }
 0x147   :  { %v3850_v54 = vld [vmem:[#allocation8 + $0x14c] ss:$16 sps:$4 sm:$0xff]  }
 0x148   :  { %v1480_v47 = vpop.f32.mrf.mxu1  ;;  %v1401_v62 = vadd.f32 %v1400_v26, %v1358_v53  ;;  %v3842_v26 = vld [vmem:[#allocation8 + $0x168] ss:$16 sps:$4 sm:$0xff]  }
 0x14a   :  { %v1482_v51 = vpop.f32.mrf.mxu1 }
 0x14c   :  { %v1484_v59 = vpop.f32.mrf.mxu1 }
 0x14e   :  { %v1486_v4 = vpop.f32.mrf.mxu1 }
 0x17f   :  { %v1437_v44 = vpop.f32.mrf.mxu0 }
 0x180   :  { %v1438_v60 = vadd.f32 %v1437_v44, %v1395_v55  ;;  %v328_v44 = vrot.slane %v4183_v45, %v327_v46  ;;  %v3854_v55 = vld [vmem:[#allocation8 + $0x128] ss:$16 sps:$4 sm:$0xff]  }
 0x181   :  { %v1439_v56 = vpop.f32.mrf.mxu0 }
 0x182   :  { %v1440_v58 = vadd.f32 %v1439_v56, %v1397_v52  ;;  %v1481_v5 = vadd.f32 %v1480_v47, %v1438_v60  ;;  %v323_v47 = vsub.s32 2, %v4179_v40 }
 0x183   :  { %v1441_v61 = vpop.f32.mrf.mxu0 }
 0x184   :  { %v1442_v63 = vadd.f32 %v1441_v61, %v1399_v57  ;;  %v1483_v1 = vadd.f32 %v1482_v51, %v1440_v58  ;;  %v1661_v10 = vmax.f32 %v1481_v5, 0.0  ;;  %v3856_v51 = vld [vmem:[#allocation8 + $0x12c] ss:$16 sps:$4 sm:$0xff]   ;;  %v324_v52 = vrot.slane %v4183_v45, %v323_v47 }
 0x185   :  { %v1443_v0 = vpop.f32.mrf.mxu0  ;;  %v3862_v58 = vld [vmem:[#allocation8 + $0x10c] ss:$16 sps:$4 sm:$0xff]  }
 0x186   :  { %v1485_v2 = vadd.f32 %v1484_v59, %v1442_v63  ;;  %v1444_v3 = vadd.f32 %v1443_v0, %v1401_v62  ;;  %v1662_v8 = vmax.f32 %v1483_v1, 0.0  ;;  %v3860_v1 = vld [vmem:[#allocation8 + $0x108] ss:$16 sps:$4 sm:$0xff]  }
 0x188   :  { %v1487_v6 = vadd.f32 %v1486_v4, %v1444_v3  ;;  %v1665_v7 = vmax.f32 %v1485_v2, 0.0  ;;  %v1523_v41 = vpop.f32.mrf.mxu1 }
 0x189   :  { %v1524_v60 = vadd.f32 %v1523_v41, %v324_v52  ;;  %v3922_v41 = vld [vmem:[#allocation10 + $0x28] sm:$0xff]  }
 0x18a   :  { %v1666_v9 = vmax.f32 %v1487_v6, 0.0  ;;  %v4191_v15 = vpack.c.bf16 %v1665_v7, %v1661_v10  ;;  %v1525_v23 = vpop.f32.mrf.mxu1 }
 0x18b   :  { %v1526_v59 = vadd.f32 %v1525_v23, %v328_v44  ;;  %v3881_v23 = vld [vmem:[#allocation8 + $0x268] ss:$16 sps:$4 sm:$0xff]  }
 0x18c   :  { %v1670_v11 = vpack.c.bf16 %v1666_v9, %v1662_v8  ;;  %v1527_v49 = vpop.f32.mrf.mxu1 }
 0x18d   :  { %v1528_v63 = vadd.f32 %v1527_v49, %v324_v52  ;;  %v3887_v49 = vld [vmem:[#allocation8 + $0x228] ss:$16 sps:$4 sm:$0xff]  }
 0x18e   :  { %2495 = vmatprep.mubr.bf16.mxu0 %v1670_v11  ;;  %v1529_v56 = vpop.f32.mrf.mxu1  ;;  %v3893_v52 = vld [vmem:[#allocation8 + $0x3e8] ss:$16 sps:$4 sm:$0xff]  }
 0x18f   :  { %2496 = vmatmul.mubr.bf16.vlgmr.msra.gmra.mxu0 %v4191_v15  ;;  %v1530_v45 = vadd.f32 %v1529_v56, %v328_v44  ;;  %v3895_v44 = vld [vmem:[#allocation8 + $0x3ec] ss:$16 sps:$4 sm:$0xff]  }
 0x190   :  { %2550 = vmatpush1.bf16.msra.mxu0 %v3773_v14  ;;  %2581 = vmatprep.mubr.bf16.mxu0 %v1670_v11  ;;  %v3901_v56 = vld [vmem:[#allocation8 + $0x3ac] ss:$16 sps:$4 sm:$0xff]  }
 0x191   :  { %2551 = vmatprep.subr.bf16.mxu0 %v3778_v16 }
 0x194   :  { %2552 = vmatpush1.bf16.msra.mxu0 %v3776_v17 }
 0x195   :  { %2553 = vmatprep.subr.bf16.mxu0 %v3784_v18 }
 0x198   :  { %2554 = vmatpush1.bf16.msra.mxu0 %v3782_v19 }
 0x199   :  { %2555 = vmatprep.subr.bf16.mxu0 %v3790_v20 }
 0x19c   :  { %2556 = vmatpush1.bf16.msra.mxu0 %v3788_v22 }
 0x19d   :  { %2557 = vmatprep.subr.bf16.mxu0 %v3796_v24 }
 0x1a0   :  { %2558 = vmatpush1.bf16.msra.mxu0 %v3794_v25 }
 0x1a1   :  { %2559 = vmatprep.subr.bf16.mxu0 %v3802_v27 }
 0x1a4   :  { %2560 = vmatpush1.bf16.msra.mxu0 %v3800_v28 }
 0x1a5   :  { %2561 = vmatprep.subr.bf16.mxu0 %v3808_v29 }
 0x1a8   :  { %2562 = vmatpush1.bf16.msra.mxu0 %v3806_v30  ;;  %v3869_v30 = vld [vmem:[#allocation8 + $0x2e8] ss:$16 sps:$4 sm:$0xff]  }
 0x1a9   :  { %2563 = vmatprep.subr.bf16.mxu0 %v3814_v31 }
 0x1ac   :  { %2564 = vmatpush1.bf16.msra.mxu0 %v3812_v32  ;;  %v3874_v32 = vld [vmem:[#allocation8 + $0x2cc] ss:$16 sps:$4 sm:$0xff]  }
 0x1ad   :  { %2565 = vmatprep.subr.bf16.mxu0 %v3820_v33  ;;  %v3917_v33 = vld [vmem:[#allocation10 + $0x78] sm:$0xff]  }
 0x1b0   :  { %2566 = vmatpush2.bf16.msra.mxu0 %v3818_v34  ;;  %v3918_v34 = vld [vmem:[#allocation10 + $0x38] sm:$0xff]  }
 0x1b1   :  { %2567 = vmatprep.subr.bf16.mxu0 %v3826_v35  ;;  %v3919_v35 = vld [vmem:[#allocation10 + $0x70] sm:$0xff]  }
 0x1b4   :  { %2568 = vmatpush2.bf16.msra.mxu0 %v3824_v36  ;;  %v3872_v36 = vld [vmem:[#allocation8 + $0x2c8] ss:$16 sps:$4 sm:$0xff]  }
 0x1b5   :  { %2569 = vmatprep.subr.bf16.mxu0 %v3832_v37  ;;  %v3920_v37 = vld [vmem:[#allocation10 + $0x30] sm:$0xff]  }
 0x1b8   :  { %2570 = vmatpush2.bf16.msra.mxu0 %v3830_v38  ;;  %v3921_v38 = vld [vmem:[#allocation10 + $0x68] sm:$0xff]  }
 0x1b9   :  { %2571 = vmatprep.subr.bf16.mxu0 %v3838_v39  ;;  %v3875_v39 = vld [vmem:[#allocation8 + $0x2a8] ss:$16 sps:$4 sm:$0xff]  }
 0x1bc   :  { %2572 = vmatpush2.bf16.msra.mxu0 %v3836_v13  ;;  %v3880_v13 = vld [vmem:[#allocation8 + $0x28c] ss:$16 sps:$4 sm:$0xff]  }
 0x1bd   :  { %2573 = vmatprep.subr.bf16.mxu0 %v3844_v43  ;;  %v3878_v43 = vld [vmem:[#allocation8 + $0x288] ss:$16 sps:$4 sm:$0xff]  }
 0x1bf   :  { %v1566_v12 = vpop.f32.mrf.mxu0 }
 0x1c0   :  { %2574 = vmatpush2.bf16.msra.mxu0 %v3842_v26  ;;  %v1567_v2 = vadd.f32 %v1566_v12, %v1524_v60  ;;  %v3883_v26 = vld [vmem:[#allocation8 + $0x26c] ss:$16 sps:$4 sm:$0xff]   ;;  %v3884_v12 = vld [vmem:[#allocation8 + $0x248] ss:$16 sps:$4 sm:$0xff]  }
 0x1c1   :  { %v1568_v50 = vpop.f32.mrf.mxu0  ;;  %2575 = vmatprep.subr.bf16.mxu0 %v3850_v54  ;;  %v3886_v54 = vld [vmem:[#allocation8 + $0x24c] ss:$16 sps:$4 sm:$0xff]  }
 0x1c2   :  { %v1569_v0 = vadd.f32 %v1568_v50, %v1526_v59  ;;  %v3892_v50 = vld [vmem:[#allocation8 + $0x20c] ss:$16 sps:$4 sm:$0xff]   ;;  %v3902_v59 = vld [vmem:[#allocation8 + $0x388] ss:$16 sps:$4 sm:$0xff]  }
 0x1c3   :  { %v1570_v53 = vpop.f32.mrf.mxu0  ;;  %v3907_v60 = vld [vmem:[#allocation8 + $0x36c] ss:$16 sps:$4 sm:$0xff]  }
 0x1c4   :  { %2576 = vmatpush2.bf16.msra.mxu0 %v3848_v48  ;;  %v1571_v5 = vadd.f32 %v1570_v53, %v1528_v63  ;;  %v3889_v48 = vld [vmem:[#allocation8 + $0x22c] ss:$16 sps:$4 sm:$0xff]   ;;  %v3908_v63 = vld [vmem:[#allocation8 + $0x348] ss:$16 sps:$4 sm:$0xff]  }
 0x1c5   :  { %v1572_v57 = vpop.f32.mrf.mxu0  ;;  %2577 = vmatprep.subr.bf16.mxu0 %v3856_v51  ;;  %v3890_v51 = vld [vmem:[#allocation8 + $0x208] ss:$16 sps:$4 sm:$0xff]   ;;  %v3898_v53 = vld [vmem:[#allocation8 + $0x3cc] ss:$16 sps:$4 sm:$0xff]  }
 0x1c6   :  { %v1573_v10 = vadd.f32 %v1572_v57, %v1530_v45  ;;  %v3899_v57 = vld [vmem:[#allocation8 + $0x3a8] ss:$16 sps:$4 sm:$0xff]   ;;  %v3924_v45 = vld [vmem:[#allocation10 + $0x20] sm:$0xff]  }
 0x1c7   :  { %v1652_v62 = vpop.f32.mrf.mxu0 }
 0x1c8   :  { %v1609_v61 = vpop.f32.mrf.mxu1  ;;  %2578 = vmatpush2.bf16.msra.mxu0 %v3854_v55  ;;  %v3896_v55 = vld [vmem:[#allocation8 + $0x3c8] ss:$16 sps:$4 sm:$0xff]  }
 0x1c9   :  { %v1654_v4 = vpop.f32.mrf.mxu0  ;;  %2579 = vmatprep.subr.bf16.mxu0 %v3862_v58  ;;  %v1610_v7 = vadd.f32 %v1609_v61, %v1567_v2  ;;  %v3904_v58 = vld [vmem:[#allocation8 + $0x38c] ss:$16 sps:$4 sm:$0xff]   ;;  %v3905_v61 = vld [vmem:[#allocation8 + $0x368] ss:$16 sps:$4 sm:$0xff]  }
 0x1ca   :  { %v1611_v3 = vpop.f32.mrf.mxu1  ;;  %v3916_v2 = vld [vmem:[#allocation8 + $0x30c] ss:$16 sps:$4 sm:$0xff]  }
 0x1cb   :  { %v1612_v6 = vadd.f32 %v1611_v3, %v1569_v0  ;;  %v1656_v9 = vpop.f32.mrf.mxu0  ;;  %v1653_v20 = vadd.f32 %v1652_v62, %v1610_v7  ;;  %v3910_v62 = vld [vmem:[#allocation8 + $0x34c] ss:$16 sps:$4 sm:$0xff]   ;;  %v3914_v3 = vld [vmem:[#allocation8 + $0x308] ss:$16 sps:$4 sm:$0xff]   ;;  %v3927_v7 = vld [vmem:[#allocation10 + $0x50] sm:$0xff]  }
 0x1cc   :  { %v1613_v8 = vpop.f32.mrf.mxu1  ;;  %2580 = vmatpush2.bf16.msra.mxu0 %v3860_v1  ;;  %v3913_v0 = vld [vmem:[#allocation8 + $0x32c] ss:$16 sps:$4 sm:$0xff]   ;;  %v3911_v1 = vld [vmem:[#allocation8 + $0x328] ss:$16 sps:$4 sm:$0xff]  }
 0x1cd   :  { %v1614_v11 = vadd.f32 %v1613_v8, %v1571_v5  ;;  %v1658_v16 = vpop.f32.mrf.mxu0  ;;  %v1655_v17 = vadd.f32 %v1654_v4, %v1612_v6  ;;  %v1663_v28 = vmax.f32 %v1653_v20, 0.0  ;;  %3372 = vmatprep.subr.bf16.mxu0 %v3917_v33  ;;  %v3923_v4 = vld [vmem:[#allocation10 + $0x60] sm:$0xff]   ;;  %v3925_v5 = vld [vmem:[#allocation10 + $0x58] sm:$0xff]   ;;  %v3928_v8 = vld [vmem:[#allocation10 + $0x10] sm:$0xff]  }
 0x1ce   :  { %v1615_v14 = vpop.f32.mrf.mxu1  ;;  %v3926_v6 = vld [vmem:[#allocation10 + $0x18] sm:$0xff]   ;;  %v3937_v20 = vld [vmem:[#allocation10 + $0xe8] sm:$0xff]   ;;  %v3947_v33 = vld [vmem:[#allocation10 + $0xc0] sm:$0xff]  }
 0x1cf   :  { %v1657_v18 = vadd.f32 %v1656_v9, %v1614_v11  ;;  %v1616_v19 = vadd.f32 %v1615_v14, %v1573_v10  ;;  %2582 = vmatmul.mubr.bf16.vlgmr.msra.gmra.mxu0 %v4191_v15  ;;  %v1664_v25 = vmax.f32 %v1655_v17, 0.0  ;;  %v3877_v15 = vld [vmem:[#allocation8 + $0x2ac] ss:$16 sps:$4 sm:$0xff]   ;;  %v3931_v11 = vld [vmem:[#allocation10 + $0x40] sm:$0xff]  }
 0x1d0   :  { %3373 = vmatpush3.bf16.msra.mxu0 %v3918_v34  ;;  %v3929_v9 = vld [vmem:[#allocation10 + $0x48] sm:$0xff]   ;;  %v3932_v14 = vld [vmem:[#allocation10] sm:$0xff]   ;;  %v3934_v17 = vld [vmem:[#allocation10 + $0xb8] sm:$0xff]  }
 0x1d1   :  { %v1659_v22 = vadd.f32 %v1658_v16, %v1616_v19  ;;  %v1667_v24 = vmax.f32 %v1657_v18, 0.0  ;;  %3374 = vmatprep.subr.bf16.mxu0 %v3919_v35  ;;  %v3930_v10 = vld [vmem:[#allocation10 + $0x8] sm:$0xff]   ;;  %v3933_v16 = vld [vmem:[#allocation10 + $0xf8] sm:$0xff]   ;;  %v3935_v18 = vld [vmem:[#allocation10 + $0xf0] sm:$0xff]  }
 0x1d2   :  { %v3936_v19 = vld [vmem:[#allocation10 + $0xb0] sm:$0xff]   ;;  %v3948_v34 = vld [vmem:[#allocation10 + $0x80] sm:$0xff]  }
 0x1d3   :  { %v1668_v27 = vmax.f32 %v1659_v22, 0.0  ;;  %v4203_v31 = vpack.c.bf16 %v1667_v24, %v1663_v28  ;;  %v3938_v22 = vld [vmem:[#allocation10 + $0xa8] sm:$0xff]   ;;  %v3939_v24 = vld [vmem:[#allocation10 + $0xe0] sm:$0xff]   ;;  %v3942_v28 = vld [vmem:[#allocation10 + $0x98] sm:$0xff]  }
 0x1d4   :  { %3375 = vmatpush3.bf16.msra.mxu0 %v3920_v37 }
 0x1d5   :  { %v1672_v29 = vpack.c.bf16 %v1668_v27, %v1664_v25  ;;  %3376 = vmatprep.subr.bf16.mxu0 %v3921_v38  ;;  %v3940_v25 = vld [vmem:[#allocation10 + $0xa0] sm:$0xff]   ;;  %v3941_v27 = vld [vmem:[#allocation10 + $0xd8] sm:$0xff]  }
 0x1d7   :  { %2538 = vmatprep.mubr.bf16.mxu1 %v1672_v29 }
 0x1d8   :  { %2539 = vmatmul.mubr.bf16.vlgmr.msra.gmra.mxu1 %v4203_v31  ;;  %3377 = vmatpush3.bf16.msra.mxu0 %v3922_v41 }
 0x1d9   :  { %2593 = vmatpush1.bf16.msra.mxu1 %v3869_v30  ;;  %2624 = vmatprep.mubr.bf16.mxu1 %v1672_v29  ;;  %v3943_v29 = vld [vmem:[#allocation10 + $0xd0] sm:$0xff]  }
 0x1da   :  { %2594 = vmatprep.subr.bf16.mxu1 %v3874_v32  ;;  %3378 = vmatprep.subr.bf16.mxu0 %v3923_v4  ;;  %v3944_v30 = vld [vmem:[#allocation10 + $0x90] sm:$0xff]   ;;  %v3946_v32 = vld [vmem:[#allocation10 + $0x88] sm:$0xff]  }
 0x1dc   :  { %3379 = vmatpush3.bf16.msra.mxu0 %v3924_v45 }
 0x1dd   :  { %2595 = vmatpush1.bf16.msra.mxu1 %v3872_v36  ;;  %3380 = vmatprep.subr.bf16.mxu0 %v3925_v5 }
 0x1de   :  { %2596 = vmatprep.subr.bf16.mxu1 %v3877_v15  ;;  %v1801_v15 = vld [vmem:[%s4228_s4] sm:$0xf] }
 0x1df   :  { %v1810_v38 = vrot.slane %v1801_v15, %v319_v21 }
 0x1e0   :  { %3381 = vmatpush3.bf16.msra.mxu0 %v3926_v6 }
 0x1e1   :  { %2597 = vmatpush1.bf16.msra.mxu1 %v3875_v39  ;;  %3382 = vmatprep.subr.bf16.mxu0 %v3927_v7  ;;  %v1806_v39 = vrot.slane %v1801_v15, %v315_v42 }
 0x1e2   :  { %2598 = vmatprep.subr.bf16.mxu1 %v3880_v13 }
 0x1e4   :  { %3383 = vmatpush3.bf16.msra.mxu0 %v3928_v8 }
 0x1e5   :  { %2599 = vmatpush1.bf16.msra.mxu1 %v3878_v43  ;;  %3384 = vmatprep.subr.bf16.mxu0 %v3929_v9 }
 0x1e6   :  { %2600 = vmatprep.subr.bf16.mxu1 %v3883_v26 }
 0x1e8   :  { %3385 = vmatpush3.bf16.msra.mxu0 %v3930_v10 }
 0x1e9   :  { %2601 = vmatpush1.bf16.msra.mxu1 %v3881_v23  ;;  %3386 = vmatprep.subr.bf16.mxu0 %v3931_v11 }
 0x1ea   :  { %2602 = vmatprep.subr.bf16.mxu1 %v3886_v54 }
 0x1ec   :  { %3387 = vmatpush3.bf16.msra.mxu0 %v3932_v14 }
 0x1ed   :  { %2603 = vmatpush1.bf16.msra.mxu1 %v3884_v12 }
 0x1ee   :  { %2604 = vmatprep.subr.bf16.mxu1 %v3889_v48 }
 0x1f1   :  { %2605 = vmatpush1.bf16.msra.mxu1 %v3887_v49 }
 0x1f2   :  { %2606 = vmatprep.subr.bf16.mxu1 %v3892_v50 }
 0x1f5   :  { %2607 = vmatpush1.bf16.msra.mxu1 %v3890_v51 }
 0x1f6   :  { %2608 = vmatprep.subr.bf16.mxu1 %v3895_v44 }
 0x1f9   :  { %2609 = vmatpush2.bf16.msra.mxu1 %v3893_v52 }
 0x1fa   :  { %2610 = vmatprep.subr.bf16.mxu1 %v3898_v53 }
 0x1fd   :  { %2611 = vmatpush2.bf16.msra.mxu1 %v3896_v55 }
 0x1fe   :  { %2612 = vmatprep.subr.bf16.mxu1 %v3901_v56 }
 0x201   :  { %2613 = vmatpush2.bf16.msra.mxu1 %v3899_v57 }
 0x202   :  { %2614 = vmatprep.subr.bf16.mxu1 %v3904_v58 }
 0x205   :  { %2615 = vmatpush2.bf16.msra.mxu1 %v3902_v59 }
 0x206   :  { %2616 = vmatprep.subr.bf16.mxu1 %v3907_v60 }
 0x209   :  { %2617 = vmatpush2.bf16.msra.mxu1 %v3905_v61  ;;  %v1818_v61 = vrot.slane %v1801_v15, %v327_v46 }
 0x20a   :  { %2618 = vmatprep.subr.bf16.mxu1 %v3910_v62  ;;  %v1814_v62 = vrot.slane %v1801_v15, %v323_v47 }
 0x20d   :  { %2619 = vmatpush2.bf16.msra.mxu1 %v3908_v63 }
 0x20e   :  { %2620 = vmatprep.subr.bf16.mxu1 %v3913_v0 }
 0x211   :  { %2621 = vmatpush2.bf16.msra.mxu1 %v3911_v1 }
 0x212   :  { %2622 = vmatprep.subr.bf16.mxu1 %v3916_v2 }
 0x215   :  { %2623 = vmatpush2.bf16.msra.mxu1 %v3914_v3 }
 0x216   :  { %3394 = vmatprep.subr.bf16.mxu1 %v3933_v16 }
 0x218   :  { %2625 = vmatmul.mubr.bf16.vlgmr.msra.gmra.mxu1 %v4203_v31  ;;  %v3945_v31 = vld [vmem:[#allocation10 + $0xc8] sm:$0xff]  }
 0x219   :  { %3395 = vmatpush3.bf16.msra.mxu1 %v3934_v17 }
 0x21a   :  { %3396 = vmatprep.subr.bf16.mxu1 %v3935_v18 }
 0x21d   :  { %3397 = vmatpush3.bf16.msra.mxu1 %v3936_v19 }
 0x21e   :  { %3398 = vmatprep.subr.bf16.mxu1 %v3937_v20 }
 0x221   :  { %3399 = vmatpush3.bf16.msra.mxu1 %v3938_v22  ;;  %v3339_v22 = vld [vmem:[%s4230_s6] ss:$0 sm:$0xff] }
 0x222   :  { %3400 = vmatprep.subr.bf16.mxu1 %v3939_v24 }
 0x225   :  { %3401 = vmatpush3.bf16.msra.mxu1 %v3940_v25 }
 0x226   :  { %3402 = vmatprep.subr.bf16.mxu1 %v3941_v27 }
 0x229   :  { %3403 = vmatpush3.bf16.msra.mxu1 %v3942_v28 }
 0x22a   :  { %3404 = vmatprep.subr.bf16.mxu1 %v3943_v29 }
 0x22d   :  { %3405 = vmatpush3.bf16.msra.mxu1 %v3944_v30 }
 0x22e   :  { %3406 = vmatprep.subr.bf16.mxu1 %v3945_v31 }
 0x231   :  { %3407 = vmatpush3.bf16.msra.mxu1 %v3946_v32 }
 0x232   :  { %3408 = vmatprep.subr.bf16.mxu1 %v3947_v33 }
 0x235   :  { %3409 = vmatpush3.bf16.msra.mxu1 %v3948_v34 }
 0x24f   :  { %v2497_v35 = vpop.f32.mrf.mxu0 }
 0x250   :  { %v2498_v54 = vadd.f32 %v2497_v35, %v1806_v39 }
 0x251   :  { %v2499_v36 = vpop.f32.mrf.mxu0 }
 0x252   :  { %v2500_v26 = vadd.f32 %v2499_v36, %v1810_v38 }
 0x253   :  { %v2501_v37 = vpop.f32.mrf.mxu0 }
 0x254   :  { %v2502_v23 = vadd.f32 %v2501_v37, %v1806_v39 }
 0x255   :  { %v2503_v41 = vpop.f32.mrf.mxu0 }
 0x256   :  { %v2504_v48 = vadd.f32 %v2503_v41, %v1810_v38 }
 0x28f   :  { %v2583_v42 = vpop.f32.mrf.mxu0 }
 0x290   :  { %v2584_v4 = vadd.f32 %v2583_v42, %v1814_v62 }
 0x291   :  { %v2585_v59 = vpop.f32.mrf.mxu0 }
 0x292   :  { %v2586_v2 = vadd.f32 %v2585_v59, %v1818_v61 }
 0x293   :  { %v2587_v60 = vpop.f32.mrf.mxu0 }
 0x294   :  { %v2588_v3 = vadd.f32 %v2587_v60, %v1814_v62 }
 0x295   :  { %v2589_v0 = vpop.f32.mrf.mxu0 }
 0x296   :  { %v2590_v5 = vadd.f32 %v2589_v0, %v1818_v61 }
 0x298   :  { %v2540_v13 = vpop.f32.mrf.mxu1 }
 0x299   :  { %v2541_v51 = vadd.f32 %v2540_v13, %v2498_v54 }
 0x29a   :  { %v2542_v43 = vpop.f32.mrf.mxu1 }
 0x29b   :  { %v2543_v49 = vadd.f32 %v2542_v43, %v2500_v26  ;;  %v2635_v21 = vmax.f32 %v2541_v51, 0.0 }
 0x29c   :  { %v2544_v12 = vpop.f32.mrf.mxu1 }
 0x29d   :  { %v2545_v50 = vadd.f32 %v2544_v12, %v2502_v23  ;;  %v2636_v55 = vmax.f32 %v2543_v49, 0.0 }
 0x29e   :  { %v2546_v44 = vpop.f32.mrf.mxu1 }
 0x29f   :  { %v2547_v52 = vadd.f32 %v2546_v44, %v2504_v48  ;;  %v2639_v53 = vmax.f32 %v2545_v50, 0.0 }
 0x2a1   :  { %v2640_v56 = vmax.f32 %v2547_v52, 0.0  ;;  %v2643_v58 = vpack.c.bf16 %v2639_v53, %v2635_v21 }
 0x2a3   :  { %v2644_v57 = vpack.c.bf16 %v2640_v56, %v2636_v55 }
 0x2a5   :  { %2942 = vmatprep.mubr.bf16.mxu0 %v2644_v57 }
 0x2a6   :  { %2943 = vmatmul.mubr.bf16.vlgmr.msra.gmra.mxu0 %v2643_v58 }
 0x2d8   :  { %v2626_v63 = vpop.f32.mrf.mxu1 }
 0x2d9   :  { %v2627_v8 = vadd.f32 %v2626_v63, %v2584_v4 }
 0x2da   :  { %v2628_v1 = vpop.f32.mrf.mxu1 }
 0x2db   :  { %v2629_v6 = vadd.f32 %v2628_v1, %v2586_v2  ;;  %v2637_v46 = vmax.f32 %v2627_v8, 0.0 }
 0x2dc   :  { %v2630_v45 = vpop.f32.mrf.mxu1 }
 0x2dd   :  { %v2631_v7 = vadd.f32 %v2630_v45, %v2588_v3  ;;  %v2638_v14 = vmax.f32 %v2629_v6, 0.0 }
 0x2de   :  { %v2632_v9 = vpop.f32.mrf.mxu1 }
 0x2df   :  { %v2633_v10 = vadd.f32 %v2632_v9, %v2590_v5  ;;  %v2641_v11 = vmax.f32 %v2631_v7, 0.0 }
 0x2e1   :  { %v2642_v16 = vmax.f32 %v2633_v10, 0.0  ;;  %v2645_v40 = vpack.c.bf16 %v2641_v11, %v2637_v46 }
 0x2e3   :  { %v2646_v17 = vpack.c.bf16 %v2642_v16, %v2638_v14 }
 0x2e5   :  { %2983 = vmatprep.mubr.bf16.mxu1 %v2646_v17 }
 0x2e6   :  { %2984 = vmatmul.mubr.bf16.vlgmr.msra.gmra.mxu1 %v2645_v40 }
 0x366   :  { %v3388_v47 = vpop.f32.mrf.mxu0 }
 0x368   :  { %v3389_v18 = vpop.f32.mrf.mxu0 }
 0x369   :  { %v3390_v20 = vadd.f32 %v3389_v18, %v3388_v47 }
 0x36a   :  { %v3391_v19 = vpop.f32.mrf.mxu0 }
 0x36b   :  { %v2945_v28 = vadd.f32 %v3390_v20, %v3339_v22 }
 0x36c   :  { %v3392_v24 = vpop.f32.mrf.mxu0 }
 0x36d   :  { %v3393_v29 = vadd.f32 %v3392_v24, %v3391_v19 }
 0x36f   :  { %v2948_v34 = vadd.f32 %v3393_v29, %v3339_v22 }
 0x3a6   :  { %v3410_v25 = vpop.f32.mrf.mxu1 }
 0x3a8   :  { %v3411_v27 = vpop.f32.mrf.mxu1 }
 0x3a9   :  { %v3412_v30 = vadd.f32 %v3411_v27, %v3410_v25 }
 0x3aa   :  { %v3413_v31 = vpop.f32.mrf.mxu1 }
 0x3ab   :  { %v2986_v32 = vadd.f32 %v3412_v30, %v2945_v28 }
 0x3ac   :  { %v3414_v33 = vpop.f32.mrf.mxu1 }
 0x3ad   :  { %2992 = vst [vmem:[#allocation11] sm:$0xff] %v2986_v32  ;;  %v3415_v35 = vadd.f32 %v3414_v33, %v3413_v31 }
 0x3af   :  { %v2989_v36 = vadd.f32 %v3415_v35, %v2948_v34 }
 0x3b1   :  { %2993 = vst [vmem:[#allocation11 + $0x8] sm:$0xff] %v2989_v36 }
 0x3b2   :  { %4060 = shalt.err (!%p4057_p1)
}
 0x3b3   :  { %s4090_s6 = smov 128   ;;  %s4091_s10 = smov 8  }
 0x3b4   :  { %3005 = dma.vmem_to_hbm [thread:$0]  %s3000_s8, 256, %s4231_s7, [#allocation4], %s4090_s6, %s4090_s6, %s4091_s10  }
 0x3b5   :  { %4075 = dma.done.wait [#allocation4], 256  }
 0x3b6   :  { %4076 = vsyncadd [#allocation4], 4294967040 }
 0x3b7   :  { %3009 = vsyncpa [#allocation3], 1 }
 0x3b8   :  { %3010 = vsyncpa [#allocation6], 1 }
 0x3b9   :  { %3011 = vsyncpa [#allocation9], 1 }
 0x3ba   :  { %3012 = vsyncpa [#allocation4], 1 }

</bundles_post_ra>
